<compile_context>
chip_gen: v7x
topology: tpu7x:2x2x1
jax: 0.10.0
libtpu: 0.0.40
codegen_flags: <defaults>
</compile_context>

<pallas_src>
import math
import numpy as np
import jax
import jax.numpy as jnp
from jax.experimental import pallas as pl
from jax.experimental.pallas import tpu as pltpu

# ----- static problem dims (mirror of the `args` used by APIQMixer) -----
N_AGENTS = 4            # args.n_agents
N_ENEMIES = 5           # args.n_enemies
ALLY_FEATS = 6          # args.state_ally_feats_size
ENEMY_FEATS = 7         # args.state_enemy_feats_size
API_HYPER_DIM = 16      # args.api_hyper_dim
EMBED_DIM = 8           # args.mixing_embed_dim == args.hypernet_embed
STATE_COMPONENT = (N_AGENTS * ALLY_FEATS, N_ENEMIES * ENEMY_FEATS)   # args.state_component
STATE_DIM = sum(STATE_COMPONENT)                                     # 59

# derived sizes for the fused block-diagonal formulation
_SA = N_AGENTS * ALLY_FEATS                 # 24  ally state cols
_SE = N_ENEMIES * ENEMY_FEATS               # 35  enemy state cols
_HA = N_AGENTS * API_HYPER_DIM              # 64
_HE = N_ENEMIES * API_HYPER_DIM             # 80
_HC = _HA + _HE                             # 144
_WA = _SA * EMBED_DIM                       # 192
_WE = _SE * EMBED_DIM                       # 280
_WC = _WA + _WE                             # 472
_MW = N_AGENTS * EMBED_DIM * EMBED_DIM      # 256
_AE = N_AGENTS * EMBED_DIM                  # 32

# lane-tile-aligned offsets inside the fused weight matrices
_HC_PAD = ((_HC + 127) // 128) * 128        # 256
_WC_PAD = ((_WC + 127) // 128) * 128        # 512

TB_DEFAULT = 1024       # max batch rows per grid step


def _round_up(x, m):
    return ((x + m - 1) // m) * m


def _cdiv(a, b):
    return (a + b - 1) // b


def _tile_and_steps(bt):
    """Pick (tile_rows, grid_steps).

    - small problems: one block covering the (16-row-padded) batch;
    - otherwise: an even number of >=2 steps (v7x: one per TensorCore under
      dimension_semantics=("parallel",)), tiles a multiple of 128 so the
      [1, tb] f32 output blocks are lane-aligned (unmasked stores).
    """
    if bt < 256:
        return max(16, _round_up(bt, 16)), 1
    steps = 2 * _cdiv(bt, 2 * TB_DEFAULT)          # even, >= 2
    tb = _round_up(_cdiv(bt, steps), 128)          # <= TB_DEFAULT by construction
    return tb, steps


def api_qmix_kernel(s_ref, q_ref,
                    w1r1_ref, b1_ref, w2m1_ref, b2m1_ref,
                    s1_ref, s2_ref, r2w2_ref, bm2_ref, rq_ref, sq_ref,
                    out_ref):
    f32 = jnp.float32
    bf16 = jnp.bfloat16
    E = EMBED_DIM
    TB = s_ref.shape[0]

    x = s_ref[...]                                                          # bf16 [TB,59]
    q = q_ref[...]                                                          # bf16 [TB,4]

    # --- fused matmul #1 (bf16 MXU): layer-1 block-diag + x-expand selector ---
    xa = jnp.dot(x, w1r1_ref[...], preferred_element_type=f32)              # [TB,728]
    h = jnp.maximum(xa[:, :_HC] + b1_ref[...], 0.0)                         # [TB,144] f32
    x_exp = xa[:, _HC_PAD:]                                                 # [TB,472] (exact x copies)

    # --- fused matmul #2 (bf16 MXU): layer-2 block-diag + hyper_main_w1 block-diag ---
    ha = jnp.dot(h.astype(bf16), w2m1_ref[...],
                 preferred_element_type=f32) + b2m1_ref[...]                # [TB,768]
    w_cat = ha[:, :_WC]                                                     # [TB,472]
    hw2 = ha[:, _WC_PAD:]                                                   # [TB,256]

    # hidden_ally + hidden_enemy:  hh[b,e] = sum_k x[b,k] * w_cat[b, k*E+e]
    # (f32 segment-sum: products are not truncated before accumulation)
    hyper_hidden = jnp.dot(x_exp * w_cat, s1_ref[...],
                           preferred_element_type=f32)                      # [TB,8]

    # --- fused matmul #3 (bf16 MXU): hyper_hidden expand + hyper_main_w2b2 ---
    hha = jnp.dot(hyper_hidden.astype(bf16), r2w2_ref[...],
                  preferred_element_type=f32)                               # [TB,265]
    hh_exp = hha[:, :_MW]                                                   # [TB,256]
    w2b2 = hha[:, _MW:] + bm2_ref[...]                                      # [TB,9]

    # main_w1[b,a,d] = |sum_e hh[b,e] * hw2[b, a,e,d]|   (f32 segment-sum)
    w1_abs = jnp.abs(jnp.dot(hh_exp * hw2, s2_ref[...],
                             preferred_element_type=f32))                   # [TB,32]

    # mix[b,d] = sum_a q[b,a] * main_w1[b,a,d] ;  hidden = elu(mix)
    q_exp = jnp.dot(q, rq_ref[...], preferred_element_type=f32)             # [TB,32]
    mix = jnp.dot(q_exp * w1_abs, sq_ref[...], preferred_element_type=f32)  # [TB,9] (col 8 == 0)
    hidden = jnp.where(mix > 0, mix, jnp.exp(jnp.minimum(mix, 0.0)) - 1.0)  # F.elu

    # final reduction: [hidden | 1] . [|main_w2| | main_b2] as one lane-dense
    # [1, TB] NT dot (no lane-axis concatenate: lane-iota selects instead).
    lane = jax.lax.broadcasted_iota(jnp.int32, (TB, E + 1), 1)
    h9 = jnp.where(lane < E, hidden, 1.0)
    w9 = jnp.where(lane < E, jnp.abs(w2b2), w2b2)
    ones_row = jnp.ones((1, E + 1), f32)
    out_ref[...] = jax.lax.dot_general(ones_row, h9 * w9,
                                       (((1,), (1,)), ((), ())),
                                       preferred_element_type=f32)          # [1,TB]


def build_constants(P):
    """Fold the per-agent / per-enemy Linears into fused block-diagonal weights
    plus 0/1 expand / segment-sum selectors.  Built once on the host.
    Weights / expand selectors -> bf16 (MXU operands); segment-sum selectors and
    biases stay f32."""
    A, NE, AF, EF, H, E = N_AGENTS, N_ENEMIES, ALLY_FEATS, ENEMY_FEATS, API_HYPER_DIM, EMBED_DIM
    wa1 = np.asarray(P["wa1"], np.float32); ba1 = np.asarray(P["ba1"], np.float32)[0]
    wwa = np.asarray(P["wwa"], np.float32); bwa = np.asarray(P["bwa"], np.float32)[0]
    we1 = np.asarray(P["we1"], np.float32); be1 = np.asarray(P["be1"], np.float32)[0]
    we2 = np.asarray(P["we2"], np.float32); be2 = np.asarray(P["be2"], np.float32)[0]
    wm1 = np.asarray(P["wm1"], np.float32); bm1 = np.asarray(P["bm1"], np.float32)[0]
    wm2 = np.asarray(P["wm2"], np.float32)
    bm2 = np.asarray(P["bm2"], np.float32).reshape(1, E + 1)

    # fused #1:  x[.,59] @ [ W1c(144) | pad(112) | R1(472) ]  -> h_pre || x_exp
    W1R1 = np.zeros((STATE_DIM, _HC_PAD + _WC), np.float32)
    b1c = np.zeros((1, _HC), np.float32)
    for a in range(A):
        W1R1[a * AF:(a + 1) * AF, a * H:(a + 1) * H] = wa1
        b1c[0, a * H:(a + 1) * H] = ba1
    for n in range(NE):
        W1R1[_SA + n * EF:_SA + (n + 1) * EF, _HA + n * H:_HA + (n + 1) * H] = we1
        b1c[0, _HA + n * H:_HA + (n + 1) * H] = be1
    for k in range(STATE_DIM):
        for e in range(E):
            W1R1[k, _HC_PAD + k * E + e] = 1.0          # x-expand selector (R1)

    S1 = np.zeros((_WC, E), np.float32)                 # sum_k, keep e
    for k in range(STATE_DIM):
        for e in range(E):
            S1[k * E + e, e] = 1.0

    # fused #2:  h[.,144] @ [ W2c(472) | pad(40) | Wm1c(256) ]  -> w_cat || hw2
    W2M1 = np.zeros((_HC, _WC_PAD + _MW), np.float32)
    b2m1 = np.zeros((1, _WC_PAD + _MW), np.float32)
    for a in range(A):
        W2M1[a * H:(a + 1) * H, a * AF * E:(a + 1) * AF * E] = wwa
        b2m1[0, a * AF * E:(a + 1) * AF * E] = bwa
    for n in range(NE):
        W2M1[_HA + n * H:_HA + (n + 1) * H, _WA + n * EF * E:_WA + (n + 1) * EF * E] = we2
        b2m1[0, _WA + n * EF * E:_WA + (n + 1) * EF * E] = be2
    for a in range(A):
        W2M1[a * H:(a + 1) * H, _WC_PAD + a * E * E:_WC_PAD + (a + 1) * E * E] = wm1
        b2m1[0, _WC_PAD + a * E * E:_WC_PAD + (a + 1) * E * E] = bm1

    # fused #3:  hh[.,8] @ [ R2(256) | wm2(9) ]  -> hh_exp || w2b2
    R2W2 = np.zeros((E, _MW + E + 1), np.float32)
    S2 = np.zeros((_MW, _AE), np.float32)               # sum_e, keep (a,d)
    for a in range(A):
        for e in range(E):
            for d in range(E):
                R2W2[e, a * E * E + e * E + d] = 1.0
                S2[a * E * E + e * E + d, a * E + d] = 1.0
    R2W2[:, _MW:] = wm2

    Rq = np.zeros((A, _AE), np.float32)                  # q[a] -> lanes a*E+d
    Sq = np.zeros((_AE, E + 1), np.float32)              # sum_a, keep d; last col = 0
    for a in range(A):
        for d in range(E):
            Rq[a, a * E + d] = 1.0
            Sq[a * E + d, d] = 1.0

    bf, f32 = jnp.bfloat16, jnp.float32
    return [jnp.asarray(W1R1, bf), jnp.asarray(b1c, f32),
            jnp.asarray(W2M1, bf), jnp.asarray(b2m1, f32),
            jnp.asarray(S1, f32), jnp.asarray(S2, f32),
            jnp.asarray(R2W2, bf), jnp.asarray(bm2, f32),
            jnp.asarray(Rq, bf), jnp.asarray(Sq, f32)]


def make_api_qmixer_forward(params):
    """Build constants once and return a jitted forward:
    (qvals [b,t,n_agents], states [b,t,state_dim]) -> [b,t,1] float32."""
    consts = build_constants(params)

    @jax.jit
    def forward(qvals, states):
        b, t, _ = qvals.shape
        bt = b * t
        tb, steps = _tile_and_steps(bt)
        bt_pad = tb * steps

        s2 = states.reshape(bt, STATE_DIM).astype(jnp.bfloat16)
        q2 = qvals.reshape(bt, N_AGENTS).astype(jnp.bfloat16)
        if bt_pad != bt:
            s2 = jnp.pad(s2, ((0, bt_pad - bt), (0, 0)))
            q2 = jnp.pad(q2, ((0, bt_pad - bt), (0, 0)))

        in_specs = [
            pl.BlockSpec((tb, STATE_DIM), lambda i: (i, 0)),
            pl.BlockSpec((tb, N_AGENTS), lambda i: (i, 0)),
        ] + [pl.BlockSpec(c.shape, lambda i: (0, 0)) for c in consts]
        out_specs = pl.BlockSpec((1, tb), lambda i: (0, i))     # lane-dense output row

        vmem_limit = (32 if tb <= 512 else 48) * 1024 * 1024
        out = pl.pallas_call(
            api_qmix_kernel,
            out_shape=jax.ShapeDtypeStruct((1, bt_pad), jnp.float32),
            grid=(steps,),
            in_specs=in_specs,
            out_specs=out_specs,
            compiler_params=pltpu.CompilerParams(
                dimension_semantics=("parallel",),   # v7x: steps shard across both TCs
                vmem_limit_bytes=vmem_limit,
            ),
        )(s2, q2, *consts)
        return out[0, :bt].reshape(b, t, 1)

    return forward


def init_params(key):
    """Deterministic kaiming_uniform_(gain=10**-0.5) weights, zero biases
    (matches APIHypernet._init_parameters)."""
    gain = 10 ** (-0.5)

    def lin(k, fan_in, fan_out):
        bound = math.sqrt(3.0) * gain / math.sqrt(fan_in)
        w = jax.random.uniform(k, (fan_in, fan_out), jnp.float32, -bound, bound)
        b = jnp.zeros((1, fan_out), jnp.float32)
        return w, b

    keys = jax.random.split(key, 6)
    P = {}
    P["wa1"], P["ba1"] = lin(keys[0], ALLY_FEATS, API_HYPER_DIM)                 # hyper_ally_embedding
    P["wwa"], P["bwa"] = lin(keys[1], API_HYPER_DIM, ALLY_FEATS * EMBED_DIM)     # hyper_w_ally
    P["we1"], P["be1"] = lin(keys[2], ENEMY_FEATS, API_HYPER_DIM)                # hyper_w_enemy[0]
    P["we2"], P["be2"] = lin(keys[3], API_HYPER_DIM, ENEMY_FEATS * EMBED_DIM)    # hyper_w_enemy[2]
    P["wm1"], P["bm1"] = lin(keys[4], API_HYPER_DIM, EMBED_DIM * EMBED_DIM)      # hyper_main_w1
    P["wm2"], P["bm2"] = lin(keys[5], EMBED_DIM, EMBED_DIM + 1)                  # hyper_main_w2b2
    return P


def reference_forward(qvals, states, P):
    """Pure-jnp f32 port of the PyTorch forward, for verification."""
    b, t, _ = qvals.shape
    bt = b * t
    E = EMBED_DIM
    states = states.reshape(bt, STATE_DIM)
    ally = states[:, :STATE_COMPONENT[0]].reshape(bt * N_AGENTS, ALLY_FEATS)
    enemy = states[:, STATE_COMPONENT[0]:].reshape(bt * N_ENEMIES, ENEMY_FEATS)

    ha = jax.nn.relu(ally @ P["wa1"] + P["ba1"])
    w_ally = (ha @ P["wwa"] + P["bwa"]).reshape(-1, ALLY_FEATS, E)
    hidden_ally = jnp.einsum("nf,nfe->ne", ally, w_ally).reshape(bt, N_AGENTS, E).sum(1)

    he = jax.nn.relu(enemy @ P["we1"] + P["be1"])
    w_en = (he @ P["we2"] + P["be2"]).reshape(-1, ENEMY_FEATS, E)
    hidden_enemy = jnp.einsum("nf,nfe->ne", enemy, w_en).reshape(bt, N_ENEMIES, E).sum(1)

    hyper_hidden = hidden_ally + hidden_enemy
    hyper_w2 = (ha @ P["wm1"] + P["bm1"]).reshape(bt, N_AGENTS, E, E)
    main_w1 = jnp.einsum("be,baed->bad", hyper_hidden, hyper_w2)

    w2b2 = hyper_hidden @ P["wm2"] + P["bm2"]
    main_w2 = jnp.abs(w2b2[:, :E])
    main_b2 = w2b2[:, E:]

    q = qvals.reshape(bt, N_AGENTS)
    hidden = jax.nn.elu(jnp.einsum("ba,bad->bd", q, jnp.abs(main_w1)))
    y = jnp.sum(hidden * main_w2, axis=1, keepdims=True) + main_b2
    return y.reshape(b, t, 1)


if __name__ == "__main__":
    key = jax.random.PRNGKey(0)
    kq, ks, kp, kq2, ks2 = jax.random.split(key, 5)
    params = init_params(kp)
    forward = make_api_qmixer_forward(params)   # constants built once, forward jitted

    # bf16 kernel vs f32 reference tolerance (weights + activations are bf16 on the MXU)
    RTOL = ATOL = 2e-2

    # --- small case (b=2, t=8): one grid step, tile shrunk to the problem ---
    b, t = 2, 8
    qvals = jax.random.normal(kq, (b, t, N_AGENTS), jnp.float32).astype(jnp.bfloat16)
    states = jax.random.normal(ks, (b, t, STATE_DIM), jnp.float32).astype(jnp.bfloat16)
    out = jax.block_until_ready(forward(qvals, states))
    ref = reference_forward(qvals.astype(jnp.float32), states.astype(jnp.float32), params)
    assert out.shape == (b, t, 1)
    if not np.allclose(np.asarray(out), np.asarray(ref), rtol=RTOL, atol=ATOL):
        raise AssertionError("Pallas kernel output mismatch vs jnp reference (small case)")

    # --- larger case (b=4, t=250): tb=512, 2 grid steps (one per v7x TC) + row padding ---
    b2, t2 = 4, 250
    qvals2 = jax.random.normal(kq2, (b2, t2, N_AGENTS), jnp.float32).astype(jnp.bfloat16)
    states2 = jax.random.normal(ks2, (b2, t2, STATE_DIM), jnp.float32).astype(jnp.bfloat16)
    out2 = jax.block_until_ready(forward(qvals2, states2))
    ref2 = reference_forward(qvals2.astype(jnp.float32), states2.astype(jnp.float32), params)
    if not np.allclose(np.asarray(out2), np.asarray(ref2), rtol=RTOL, atol=ATOL):
        raise AssertionError("Pallas kernel output mismatch vs jnp reference (large case)")

    print("KERNEL_OK")
</pallas_src>

<mosaic_0001>
module attributes {stable_mosaic.version = 11 : i64} {
  func.func @api_qmix_kernel(%arg0: i32, %arg1: memref<16x59xbf16, #tpu.memory_space<vmem>>, %arg2: memref<16x4xbf16, #tpu.memory_space<vmem>>, %arg3: memref<59x728xbf16, #tpu.memory_space<vmem>>, %arg4: memref<1x144xf32, #tpu.memory_space<vmem>>, %arg5: memref<144x768xbf16, #tpu.memory_space<vmem>>, %arg6: memref<1x768xf32, #tpu.memory_space<vmem>>, %arg7: memref<472x8xf32, #tpu.memory_space<vmem>>, %arg8: memref<256x32xf32, #tpu.memory_space<vmem>>, %arg9: memref<8x265xbf16, #tpu.memory_space<vmem>>, %arg10: memref<1x9xf32, #tpu.memory_space<vmem>>, %arg11: memref<4x32xbf16, #tpu.memory_space<vmem>>, %arg12: memref<32x9xf32, #tpu.memory_space<vmem>>, %arg13: memref<1x16xf32, #tpu.memory_space<vmem>>) attributes {dimension_semantics = [#tpu.dimension_semantics<parallel>], iteration_bounds = array<i64: 1>, scalar_prefetch = 0 : i64, scratch_operands = 0 : i64, tpu.core_type = #tpu.core_type<tc>, window_params = [{transform_indices = @transform_0, window_bounds = array<i64: 16, 59>}, {transform_indices = @transform_1, window_bounds = array<i64: 16, 4>}, {pipeline_mode = #tpu.pipeline_mode<synchronous>, transform_indices = @transform_2, window_bounds = array<i64: 59, 728>}, {pipeline_mode = #tpu.pipeline_mode<synchronous>, transform_indices = @transform_3, window_bounds = array<i64: 1, 144>}, {pipeline_mode = #tpu.pipeline_mode<synchronous>, transform_indices = @transform_4, window_bounds = array<i64: 144, 768>}, {pipeline_mode = #tpu.pipeline_mode<synchronous>, transform_indices = @transform_5, window_bounds = array<i64: 1, 768>}, {pipeline_mode = #tpu.pipeline_mode<synchronous>, transform_indices = @transform_6, window_bounds = array<i64: 472, 8>}, {pipeline_mode = #tpu.pipeline_mode<synchronous>, transform_indices = @transform_7, window_bounds = array<i64: 256, 32>}, {pipeline_mode = #tpu.pipeline_mode<synchronous>, transform_indices = @transform_8, window_bounds = array<i64: 8, 265>}, {pipeline_mode = #tpu.pipeline_mode<synchronous>, transform_indices = @transform_9, window_bounds = array<i64: 1, 9>}, {pipeline_mode = #tpu.pipeline_mode<synchronous>, transform_indices = @transform_10, window_bounds = array<i64: 4, 32>}, {pipeline_mode = #tpu.pipeline_mode<synchronous>, transform_indices = @transform_11, window_bounds = array<i64: 32, 9>}, {transform_indices = @transform_12, window_bounds = array<i64: 1, 16>}]} {
    %c0 = arith.constant 0 : index
    %c0_0 = arith.constant 0 : index
    %0 = vector.load %arg1[%c0, %c0_0] : memref<16x59xbf16, #tpu.memory_space<vmem>>, vector<16x59xbf16>
    %c0_1 = arith.constant 0 : index
    %c0_2 = arith.constant 0 : index
    %1 = vector.load %arg2[%c0_1, %c0_2] : memref<16x4xbf16, #tpu.memory_space<vmem>>, vector<16x4xbf16>
    %c0_3 = arith.constant 0 : index
    %c0_4 = arith.constant 0 : index
    %2 = vector.load %arg3[%c0_3, %c0_4] : memref<59x728xbf16, #tpu.memory_space<vmem>>, vector<59x728xbf16>
    %cst = arith.constant dense<0.000000e+00> : vector<16x728xf32>
    %3 = tpu.matmul %0, %2, %cst {dimension_numbers = #tpu.dot_dimension_numbers<[1], [0], [0], [1], [0, 0, 1, 1], [], []>} : vector<16x59xbf16>, vector<59x728xbf16>, vector<16x728xf32> -> vector<16x728xf32>
    %4 = vector.extract_strided_slice %3 {offsets = [0, 0], sizes = [16, 144], strides = [1, 1]} : vector<16x728xf32> to vector<16x144xf32>
    %c0_5 = arith.constant 0 : index
    %c0_6 = arith.constant 0 : index
    %5 = vector.load %arg4[%c0_5, %c0_6] : memref<1x144xf32, #tpu.memory_space<vmem>>, vector<1x144xf32>
    %6 = vector.broadcast %5 : vector<1x144xf32> to vector<16x144xf32>
    %7 = arith.addf %4, %6 : vector<16x144xf32>
    %cst_7 = arith.constant 0.000000e+00 : f32
    %8 = vector.broadcast %cst_7 : f32 to vector<16x144xf32>
    %9 = arith.maximumf %7, %8 : vector<16x144xf32>
    %10 = vector.extract_strided_slice %3 {offsets = [0, 256], sizes = [16, 472], strides = [1, 1]} : vector<16x728xf32> to vector<16x472xf32>
    %11 = arith.truncf %9 : vector<16x144xf32> to vector<16x144xbf16>
    %c0_8 = arith.constant 0 : index
    %c0_9 = arith.constant 0 : index
    %12 = vector.load %arg5[%c0_8, %c0_9] : memref<144x768xbf16, #tpu.memory_space<vmem>>, vector<144x768xbf16>
    %cst_10 = arith.constant dense<0.000000e+00> : vector<16x768xf32>
    %13 = tpu.matmul %11, %12, %cst_10 {dimension_numbers = #tpu.dot_dimension_numbers<[1], [0], [0], [1], [0, 0, 1, 1], [], []>} : vector<16x144xbf16>, vector<144x768xbf16>, vector<16x768xf32> -> vector<16x768xf32>
    %c0_11 = arith.constant 0 : index
    %c0_12 = arith.constant 0 : index
    %14 = vector.load %arg6[%c0_11, %c0_12] : memref<1x768xf32, #tpu.memory_space<vmem>>, vector<1x768xf32>
    %15 = vector.broadcast %14 : vector<1x768xf32> to vector<16x768xf32>
    %16 = arith.addf %13, %15 : vector<16x768xf32>
    %17 = vector.extract_strided_slice %16 {offsets = [0, 0], sizes = [16, 472], strides = [1, 1]} : vector<16x768xf32> to vector<16x472xf32>
    %18 = vector.extract_strided_slice %16 {offsets = [0, 512], sizes = [16, 256], strides = [1, 1]} : vector<16x768xf32> to vector<16x256xf32>
    %19 = arith.mulf %10, %17 : vector<16x472xf32>
    %c0_13 = arith.constant 0 : index
    %c0_14 = arith.constant 0 : index
    %20 = vector.load %arg7[%c0_13, %c0_14] : memref<472x8xf32, #tpu.memory_space<vmem>>, vector<472x8xf32>
    %cst_15 = arith.constant dense<0.000000e+00> : vector<16x8xf32>
    %21 = tpu.matmul %19, %20, %cst_15 {dimension_numbers = #tpu.dot_dimension_numbers<[1], [0], [0], [1], [0, 0, 1, 1], [], []>} : vector<16x472xf32>, vector<472x8xf32>, vector<16x8xf32> -> vector<16x8xf32>
    %22 = arith.truncf %21 : vector<16x8xf32> to vector<16x8xbf16>
    %c0_16 = arith.constant 0 : index
    %c0_17 = arith.constant 0 : index
    %23 = vector.load %arg9[%c0_16, %c0_17] : memref<8x265xbf16, #tpu.memory_space<vmem>>, vector<8x265xbf16>
    %cst_18 = arith.constant dense<0.000000e+00> : vector<16x265xf32>
    %24 = tpu.matmul %22, %23, %cst_18 {dimension_numbers = #tpu.dot_dimension_numbers<[1], [0], [0], [1], [0, 0, 1, 1], [], []>} : vector<16x8xbf16>, vector<8x265xbf16>, vector<16x265xf32> -> vector<16x265xf32>
    %25 = vector.extract_strided_slice %24 {offsets = [0, 0], sizes = [16, 256], strides = [1, 1]} : vector<16x265xf32> to vector<16x256xf32>
    %26 = vector.extract_strided_slice %24 {offsets = [0, 256], sizes = [16, 9], strides = [1, 1]} : vector<16x265xf32> to vector<16x9xf32>
    %c0_19 = arith.constant 0 : index
    %c0_20 = arith.constant 0 : index
    %27 = vector.load %arg10[%c0_19, %c0_20] : memref<1x9xf32, #tpu.memory_space<vmem>>, vector<1x9xf32>
    %28 = vector.broadcast %27 : vector<1x9xf32> to vector<16x9xf32>
    %29 = arith.addf %26, %28 : vector<16x9xf32>
    %30 = arith.mulf %25, %18 : vector<16x256xf32>
    %c0_21 = arith.constant 0 : index
    %c0_22 = arith.constant 0 : index
    %31 = vector.load %arg8[%c0_21, %c0_22] : memref<256x32xf32, #tpu.memory_space<vmem>>, vector<256x32xf32>
    %cst_23 = arith.constant dense<0.000000e+00> : vector<16x32xf32>
    %32 = tpu.matmul %30, %31, %cst_23 {dimension_numbers = #tpu.dot_dimension_numbers<[1], [0], [0], [1], [0, 0, 1, 1], [], []>} : vector<16x256xf32>, vector<256x32xf32>, vector<16x32xf32> -> vector<16x32xf32>
    %33 = math.absf %32 : vector<16x32xf32>
    %c0_24 = arith.constant 0 : index
    %c0_25 = arith.constant 0 : index
    %34 = vector.load %arg11[%c0_24, %c0_25] : memref<4x32xbf16, #tpu.memory_space<vmem>>, vector<4x32xbf16>
    %cst_26 = arith.constant dense<0.000000e+00> : vector<16x32xf32>
    %35 = tpu.matmul %1, %34, %cst_26 {dimension_numbers = #tpu.dot_dimension_numbers<[1], [0], [0], [1], [0, 0, 1, 1], [], []>} : vector<16x4xbf16>, vector<4x32xbf16>, vector<16x32xf32> -> vector<16x32xf32>
    %36 = arith.mulf %35, %33 : vector<16x32xf32>
    %c0_27 = arith.constant 0 : index
    %c0_28 = arith.constant 0 : index
    %37 = vector.load %arg12[%c0_27, %c0_28] : memref<32x9xf32, #tpu.memory_space<vmem>>, vector<32x9xf32>
    %cst_29 = arith.constant dense<0.000000e+00> : vector<16x9xf32>
    %38 = tpu.matmul %36, %37, %cst_29 {dimension_numbers = #tpu.dot_dimension_numbers<[1], [0], [0], [1], [0, 0, 1, 1], [], []>} : vector<16x32xf32>, vector<32x9xf32>, vector<16x9xf32> -> vector<16x9xf32>
    %cst_30 = arith.constant 0.000000e+00 : f32
    %39 = vector.broadcast %cst_30 : f32 to vector<16x9xf32>
    %40 = arith.cmpf ogt, %38, %39 : vector<16x9xf32>
    %cst_31 = arith.constant 0.000000e+00 : f32
    %41 = vector.broadcast %cst_31 : f32 to vector<16x9xf32>
    %42 = arith.minimumf %38, %41 : vector<16x9xf32>
    %43 = math.exp %42 : vector<16x9xf32>
    %cst_32 = arith.constant 1.000000e+00 : f32
    %44 = vector.broadcast %cst_32 : f32 to vector<16x9xf32>
    %45 = arith.subf %43, %44 : vector<16x9xf32>
    %46 = arith.select %40, %38, %45 : vector<16x9xi1>, vector<16x9xf32>
    %47 = tpu.iota {dimensions = array<i32: 1>} : vector<16x9xi32>
    %c8_i32 = arith.constant 8 : i32
    %48 = vector.broadcast %c8_i32 : i32 to vector<16x9xi32>
    %49 = arith.cmpi slt, %47, %48 : vector<16x9xi32>
    %cst_33 = arith.constant 1.000000e+00 : f32
    %50 = vector.broadcast %cst_33 : f32 to vector<16x9xf32>
    %51 = arith.select %49, %46, %50 : vector<16x9xi1>, vector<16x9xf32>
    %c8_i32_34 = arith.constant 8 : i32
    %52 = vector.broadcast %c8_i32_34 : i32 to vector<16x9xi32>
    %53 = arith.cmpi slt, %47, %52 : vector<16x9xi32>
    %54 = math.absf %29 : vector<16x9xf32>
    %55 = arith.select %53, %54, %29 : vector<16x9xi1>, vector<16x9xf32>
    %cst_35 = arith.constant 1.000000e+00 : f32
    %56 = vector.broadcast %cst_35 : f32 to vector<1x9xf32>
    %57 = arith.mulf %51, %55 : vector<16x9xf32>
    %cst_36 = arith.constant dense<0.000000e+00> : vector<1x16xf32>
    %58 = tpu.matmul %56, %57, %cst_36 {dimension_numbers = #tpu.dot_dimension_numbers<[1], [1], [0], [0], [0, 0, 1, 0], [], []>} : vector<1x9xf32>, vector<16x9xf32>, vector<1x16xf32> -> vector<1x16xf32>
    %c0_37 = arith.constant 0 : index
    %c0_38 = arith.constant 0 : index
    %59 = vector.load %arg13[%c0_37, %c0_38] : memref<1x16xf32, #tpu.memory_space<vmem>>, vector<1x16xf32>
    tpu.vector_store %arg13[%c0_37, %c0_38], %58 {strides = array<i32>} : memref<1x16xf32, #tpu.memory_space<vmem>>, vector<1x16xf32>,
    return
  }
  func.func @transform_0(%arg0: i32) -> (i32, i32) {
    %c0_i32 = arith.constant 0 : i32
    %c0_i32_0 = arith.constant 0 : i32
    return %arg0, %c0_i32 : i32, i32
  }
  func.func @transform_1(%arg0: i32) -> (i32, i32) {
    %c0_i32 = arith.constant 0 : i32
    %c0_i32_0 = arith.constant 0 : i32
    return %arg0, %c0_i32 : i32, i32
  }
  func.func @transform_2(%arg0: i32) -> (i32, i32) {
    %c0_i32 = arith.constant 0 : i32
    %c0_i32_0 = arith.constant 0 : i32
    %c0_i32_1 = arith.constant 0 : i32
    return %c0_i32, %c0_i32_0 : i32, i32
  }
  func.func @transform_3(%arg0: i32) -> (i32, i32) {
    %c0_i32 = arith.constant 0 : i32
    %c0_i32_0 = arith.constant 0 : i32
    %c0_i32_1 = arith.constant 0 : i32
    return %c0_i32, %c0_i32_0 : i32, i32
  }
  func.func @transform_4(%arg0: i32) -> (i32, i32) {
    %c0_i32 = arith.constant 0 : i32
    %c0_i32_0 = arith.constant 0 : i32
    %c0_i32_1 = arith.constant 0 : i32
    return %c0_i32, %c0_i32_0 : i32, i32
  }
  func.func @transform_5(%arg0: i32) -> (i32, i32) {
    %c0_i32 = arith.constant 0 : i32
    %c0_i32_0 = arith.constant 0 : i32
    %c0_i32_1 = arith.constant 0 : i32
    return %c0_i32, %c0_i32_0 : i32, i32
  }
  func.func @transform_6(%arg0: i32) -> (i32, i32) {
    %c0_i32 = arith.constant 0 : i32
    %c0_i32_0 = arith.constant 0 : i32
    %c0_i32_1 = arith.constant 0 : i32
    return %c0_i32, %c0_i32_0 : i32, i32
  }
  func.func @transform_7(%arg0: i32) -> (i32, i32) {
    %c0_i32 = arith.constant 0 : i32
    %c0_i32_0 = arith.constant 0 : i32
    %c0_i32_1 = arith.constant 0 : i32
    return %c0_i32, %c0_i32_0 : i32, i32
  }
  func.func @transform_8(%arg0: i32) -> (i32, i32) {
    %c0_i32 = arith.constant 0 : i32
    %c0_i32_0 = arith.constant 0 : i32
    %c0_i32_1 = arith.constant 0 : i32
    return %c0_i32, %c0_i32_0 : i32, i32
  }
  func.func @transform_9(%arg0: i32) -> (i32, i32) {
    %c0_i32 = arith.constant 0 : i32
    %c0_i32_0 = arith.constant 0 : i32
    %c0_i32_1 = arith.constant 0 : i32
    return %c0_i32, %c0_i32_0 : i32, i32
  }
  func.func @transform_10(%arg0: i32) -> (i32, i32) {
    %c0_i32 = arith.constant 0 : i32
    %c0_i32_0 = arith.constant 0 : i32
    %c0_i32_1 = arith.constant 0 : i32
    return %c0_i32, %c0_i32_0 : i32, i32
  }
  func.func @transform_11(%arg0: i32) -> (i32, i32) {
    %c0_i32 = arith.constant 0 : i32
    %c0_i32_0 = arith.constant 0 : i32
    %c0_i32_1 = arith.constant 0 : i32
    return %c0_i32, %c0_i32_0 : i32, i32
  }
  func.func @transform_12(%arg0: i32) -> (i32, i32) {
    %c0_i32 = arith.constant 0 : i32
    %c0_i32_0 = arith.constant 0 : i32
    return %c0_i32, %arg0 : i32, i32
  }
}

</mosaic_0001>

<bundles_post_ra>
// kernel: squeeze.1
= control target key start
LH: loop header
LB: loop body
LE: loop exit
PB: predicated region body
PF: predicated region fallthrough
CT: control target
= control target key end

     0   :  { %s85_s0 = inlined_call_operand.vmem [shape: f32[16], index: 0, kind: input, shape index: {}]   ;;  %s86_s1 = inlined_call_operand.hbm [shape: f32[2,8,1], index: 1, kind: output, shape index: {}]  }
   0x1   :  { %v5_v0 = vld [vmem:[%s85_s0] sm:$0x1] }
   0x2   :  { %2 = vsyncpa [#allocation1], 0  ;;  %6 = vst [vmem:[#allocation3] sm:$0x1] %v5_v0  ;;  %vm8_vm0 = vcmask 64512   ;;  %s58_s0 = smov 120  }
   0x3   :  { %s59_s8 = smov [#allocation0]  }
   0x4   :  { %s26_s9 = sshll.u32 %s59_s8, 4  ;;  %s27_s9 = int_to_ptr.vmem [resolvable:$true] %s26_s9 }
   0x5   :  { %s34_s10 = scalar_lea.vmem %s27_s9, 32  ;;  %p39_p1 = scmp.lt.s32.totalorder %s27_s9, %s27_s9 }
   0x6   :  { %p35_p0 = scmp.ne.s32.totalorder %s27_s9, %s34_s10  ;;  %p40_p2 = scmp.lt.s32.totalorder %s34_s10, %s34_s10 }
   0x8   :  { %p41_p3 = por %p40_p2, %p39_p1 }
   0x9   :  { %v10_v1 = vld [vmem:[#allocation3] sm:$0x1]  }
   0xa   :  { %v7_v2 = vld [vmem:[#allocation3] sm:$0x1]   ;;  %11 = vrot.lane.b32.xlu0 %v10_v1, %s58_s0  ;;  %p42_p4 = pnand %p41_p3, %p35_p0 }
   0xb   :  { %9 = vst.msk [vmem:[#allocation2] sm:$0x1] %vm8_vm0, %v7_v2  }
  0x7c   :  { %v12_v3 = vpop.permute.xlu0 %11  }
  0x7d   :  { %15 = vst.msk [vmem:[#allocation2 + $0x1] sm:$0x1] %vm8_vm0, %v12_v3  }
  0x84   :  { %v19_v4 = vld [vmem:[#allocation2] sm:$0x3] }
  0x85   :  { %21 = vst [vmem:[#allocation0] sm:$0x3] %v19_v4 }
  0x86   :  { %45 = shalt.err (!%p42_p4)
}
  0x87   :  { %s46_s13 = scalar_lea.hbm %s86_s1, 32 }
  0x88   :  { %p47_p5 = scmp.ne.s32.totalorder %s86_s1, %s46_s13  ;;  %p50_p6 = scmp.lt.u32.totalorder %s46_s13, %s86_s1 }
  0x8a   :  { %p52_p7 = pnand %p50_p6, %p47_p5 }
  0x8c   :  { %55 = shalt.err (!%p52_p7)
}
  0x8d   :  { %29 = dma.vmem_to_hbm [thread:$0]  %s27_s9, 32, %s86_s1, [#allocation1]  }
  0x8e   :  { %56 = dma.done.wait [#allocation1], 32  }
  0x8f   :  { %57 = vsyncadd [#allocation1], 4294967264 }
  0x90   :  { %31 = vsyncpa [#allocation1], 1 }

// kernel: forward.1
= control target key start
LH: loop header
LB: loop body
LE: loop exit
PB: predicated region body
PF: predicated region fallthrough
CT: control target
= control target key end

     0   :  { %17 = vsyncpa [#allocation3], 0  ;;  %s2902_s0 = inlined_call_operand.hbm [shape: bf16[16,59], index: 0, kind: input, shape index: {}]   ;;  %s2903_s1 = inlined_call_operand.vmem [shape: bf16[16,4], index: 1, kind: input, shape index: {}]   ;;  %s2904_s2 = inlined_call_operand.vmem [shape: bf16[59,728], index: 2, kind: input, shape index: {}]   ;;  %s2905_s3 = inlined_call_operand.vmem [shape: f32[1,144], index: 3, kind: input, shape index: {}]   ;;  %s2906_s4 = inlined_call_operand.vmem [shape: bf16[144,768], index: 4, kind: input, shape index: {}]   ;;  %s2907_s5 = inlined_call_operand.vmem [shape: f32[1,768], index: 5, kind: input, shape index: {}]   ;;  %s2908_s6 = inlined_call_operand.vmem [shape: f32[472,8], index: 6, kind: input, shape index: {}]   ;;  %s2909_s7 = inlined_call_operand.vmem [shape: f32[256,32], index: 7, kind: input, shape index: {}]   ;;  %s2910_s8 = inlined_call_operand.hbm [shape: bf16[8,265], index: 8, kind: input, shape index: {}]   ;;  %s2911_s9 = inlined_call_operand.vmem [shape: f32[1,9], index: 9, kind: input, shape index: {}]   ;;  %s2912_s10 = inlined_call_operand.vmem [shape: bf16[4,32], index: 10, kind: input, shape index: {}]   ;;  %s2913_s11 = inlined_call_operand.hbm [shape: f32[32,9], index: 11, kind: input, shape index: {}]   ;;  %s2914_s12 = inlined_call_operand.vmem [shape: f32[1,16], index: 12, kind: output, shape index: {}]  }
   0x1   :  { %18 = vsyncpa [#allocation5], 0  ;;  %s2149_s21 = smov [#allocation4]   ;;  %s2150_s23 = smov [#allocation2]  }
   0x2   :  { %s51_s22 = sshll.u32 %s2149_s21, 4  ;;  %s24_s24 = sshll.u32 %s2150_s23, 4  ;;  %s52_s22 = int_to_ptr.vmem [resolvable:$true] %s51_s22  ;;  %s2227_s24 = int_to_ptr.vmem [resolvable:$true] %s24_s24 }
   0x3   :  { %s2079_s27 = scalar_lea.hbm %s2910_s8, 192 }
   0x4   :  { %p2080_p0 = scmp.ne.s32.totalorder %s2910_s8, %s2079_s27  ;;  %p2083_p1 = scmp.lt.u32.totalorder %s2079_s27, %s2910_s8 }
   0x6   :  { %p2085_p2 = pnand %p2083_p1, %p2080_p0 }
   0x8   :  { %2088 = shalt.err (!%p2085_p2)
}
   0x9   :  { %s2089_s14 = scalar_lea.vmem %s52_s22, 192  ;;  %p2094_p4 = scmp.lt.s32.totalorder %s52_s22, %s52_s22 }
   0xa   :  { %p2090_p3 = scmp.ne.s32.totalorder %s52_s22, %s2089_s14  ;;  %p2095_p5 = scmp.lt.s32.totalorder %s2089_s14, %s2089_s14 }
   0xc   :  { %p2096_p6 = por %p2095_p5, %p2094_p4 }
   0xe   :  { %p2097_p7 = pnand %p2096_p6, %p2090_p3 }
  0x10   :  { %2100 = shalt.err (!%p2097_p7)
}
  0x11   :  { %54 = dma.hbm_to_vmem [thread:$0]  %s2910_s8, 192, %s52_s22, [#allocation5]  }
  0x12   :  { %s2101_s19 = scalar_lea.hbm %s2902_s0, 128 }
  0x13   :  { %p2102_p8 = scmp.ne.s32.totalorder %s2902_s0, %s2101_s19  ;;  %p2105_p9 = scmp.lt.u32.totalorder %s2101_s19, %s2902_s0 }
  0x15   :  { %p2107_p10 = pnand %p2105_p9, %p2102_p8 }
  0x17   :  { %2110 = shalt.err (!%p2107_p10)
}
  0x18   :  { %s2111_s26 = scalar_lea.vmem %s2227_s24, 128  ;;  %p2116_p12 = scmp.lt.s32.totalorder %s2227_s24, %s2227_s24 }
  0x19   :  { %p2112_p11 = scmp.ne.s32.totalorder %s2227_s24, %s2111_s26  ;;  %p2117_p13 = scmp.lt.s32.totalorder %s2111_s26, %s2111_s26 }
  0x1b   :  { %p2118_p0 = por %p2117_p13, %p2116_p12 }
  0x1d   :  { %p2119_p1 = pnand %p2118_p0, %p2112_p11 }
  0x1f   :  { %2122 = shalt.err (!%p2119_p1)
}
  0x20   :  { %s2151_s8 = smov 64   ;;  %s2152_s22 = smov 4  }
  0x21   :  { %30 = dma.hbm_to_vmem [thread:$0]  %s2902_s0, 128, %s2227_s24, [#allocation3], %s2151_s8, %s2151_s8, %s2152_s22  }
  0x22   :  { %s2153_s29 = smov [#allocation6]   ;;  %s2123_s15 = scalar_lea.hbm %s2913_s11, 512 }
  0x23   :  { %s64_s30 = sshll.u32 %s2153_s29, 4  ;;  %p2124_p2 = scmp.ne.s32.totalorder %s2913_s11, %s2123_s15  ;;  %s65_s30 = int_to_ptr.vmem [resolvable:$true] %s64_s30 }
  0x24   :  { %p2127_p3 = scmp.lt.u32.totalorder %s2123_s15, %s2913_s11 }
  0x26   :  { %p2129_p4 = pnand %p2127_p3, %p2124_p2 }
  0x28   :  { %2132 = shalt.err (!%p2129_p4)
}
  0x29   :  { %s2133_s20 = scalar_lea.vmem %s65_s30, 512  ;;  %p2138_p6 = scmp.lt.s32.totalorder %s65_s30, %s65_s30 }
  0x2a   :  { %p2134_p5 = scmp.ne.s32.totalorder %s65_s30, %s2133_s20  ;;  %p2139_p7 = scmp.lt.s32.totalorder %s2133_s20, %s2133_s20 }
  0x2c   :  { %p2140_p8 = por %p2139_p7, %p2138_p6 }
  0x2e   :  { %p2141_p9 = pnand %p2140_p8, %p2134_p5 }
  0x30   :  { %2144 = shalt.err (!%p2141_p9)
}
  0x31   :  { %s2154_s0 = smov 128   ;;  %s2155_s24 = smov 8  }
  0x32   :  { %70 = dma.hbm_to_vmem [thread:$0]  %s2913_s11, 512, %s65_s30, [#allocation5], %s2154_s0, %s2154_s0, %s2155_s24  }
  0x33   :  { %2145 = dma.done.wait [#allocation3], 128  }
  0x34   :  { %2146 = vsyncadd [#allocation3], 4294967168 }
  0x35   :  { %2147 = dma.done.wait [#allocation5], 704  }
  0x36   :  { %2148 = vsyncadd [#allocation5], 4294966592  ;;  %v2156_v0 = vmov 0   ;;  %vm232_vm0 = vcmask 1044480   ;;  %v1953_v1 = vld [vmem:[%s2904_s2 + $0x4] ss:$24 sps:$4 sm:$0xff]  }
  0x37   :  { %286 = vmatprep.mubr.bf16.mxu0 %v2156_v0  ;;  %329 = vmatprep.mubr.bf16.mxu1 %v2156_v0  ;;  %v1955_v2 = vld [vmem:[%s2904_s2] ss:$24 sps:$4 sm:$0xff]   ;;  %v1956_v3 = vld [vmem:[%s2904_s2 + $0x34] ss:$24 sps:$4 sm:$0xff]   ;;  %vm233_vm1 = vcmask 1045504   ;;  %v2157_v4 = vmov 65535  }
  0x38   :  { %254 = vmatprep.subr.bf16.mxu0 %v1953_v1  ;;  %v234_v5 = vsel %vm232_vm0, 4294967295, %v2157_v4  ;;  %v1958_v6 = vld [vmem:[%s2904_s2 + $0x30] ss:$24 sps:$4 sm:$0xff]   ;;  %v1959_v7 = vld [vmem:[%s2904_s2 + $0x64] ss:$24 sps:$4 sm:$0xff]   ;;  %vm228_vm2 = vcmask 482304  }
  0x39   :  { %255 = vmatpush1.bf16.msra.mxu0 %v1955_v2  ;;  %v1962_v8 = vld [vmem:[%s2904_s2 + $0x94] ss:$24 sps:$4 sm:$0x3f]   ;;  %v1961_v9 = vld [vmem:[%s2904_s2 + $0x60] ss:$24 sps:$4 sm:$0xff]   ;;  %v235_v10 = vsel %vm233_vm1, %v234_v5, 0 }
  0x3a   :  { %256 = vmatprep.subr.bf16.mxu0 %v1956_v3  ;;  %v1964_v11 = vld [vmem:[%s2904_s2 + $0x90] ss:$24 sps:$4 sm:$0x3f]   ;;  %v1966_v12 = vld [vmem:[%s2904_s2 + $0xc] ss:$24 sps:$4 sm:$0xff]   ;;  %v240_v14 = vand.u32 %v1962_v8, %v235_v10  ;;  %vm761_vm3 = vcmask 130048  }
  0x3b   :  { %v1968_v13 = vld [vmem:[%s2904_s2 + $0x8] ss:$24 sps:$4 sm:$0xff]   ;;  %297 = vmatprep.subr.bf16.mxu1 %v1966_v12  ;;  %v1972_v15 = vld [vmem:[%s2904_s2 + $0x3c] ss:$24 sps:$4 sm:$0xff]   ;;  %v1974_v16 = vld [vmem:[%s2904_s2 + $0x38] ss:$24 sps:$4 sm:$0xff]   ;;  %v237_v17 = vand.u32 %v1964_v11, %v235_v10  ;;  %v385_v12 = vlaneseq }
  0x3c   :  { %298 = vmatpush1.bf16.msra.mxu1 %v1968_v13  ;;  %v1965_v18 = vld [vmem:[#allocation2] sm:$0xff]   ;;  %v1971_v19 = vld [vmem:[%s2904_s2 + $0x14] ss:$24 sps:$4 sm:$0xff]   ;;  %v1969_v21 = vld [vmem:[%s2904_s2 + $0x10] ss:$24 sps:$4 sm:$0xff]   ;;  %vm961_vm4 = vcmask 719872  }
  0x3d   :  { %257 = vmatpush1.bf16.msra.mxu0 %v1958_v6  ;;  %299 = vmatprep.subr.bf16.mxu1 %v1972_v15  ;;  %v1978_v20 = vld [vmem:[%s2904_s2 + $0x6c] ss:$24 sps:$4 sm:$0xff]   ;;  %v1980_v22 = vld [vmem:[%s2904_s2 + $0x68] ss:$24 sps:$4 sm:$0xff]   ;;  %v2001_v44 = vld [vmem:[%s2906_s4 + $0x3c] ss:$24 sps:$4 sm:$0xff]  }
  0x3e   :  { %258 = vmatprep.subr.bf16.mxu0 %v1959_v7  ;;  %v1984_v23 = vld [vmem:[%s2904_s2 + $0x9c] ss:$24 sps:$4 sm:$0x3f]   ;;  %v1986_v24 = vld [vmem:[%s2904_s2 + $0x98] ss:$24 sps:$4 sm:$0x3f]  }
  0x3f   :  { %v1977_v25 = vld [vmem:[%s2904_s2 + $0x44] ss:$24 sps:$4 sm:$0xff]   ;;  %v246_v26 = vand.u32 %v1984_v23, %v235_v10  ;;  %v1975_v27 = vld [vmem:[%s2904_s2 + $0x40] ss:$24 sps:$4 sm:$0xff]   ;;  %v243_v28 = vand.u32 %v1986_v24, %v235_v10  ;;  %v1983_v29 = vld [vmem:[%s2904_s2 + $0x74] ss:$24 sps:$4 sm:$0xff]  }
  0x40   :  { %300 = vmatpush1.bf16.msra.mxu1 %v1974_v16  ;;  %v1992_v30 = vld [vmem:[%s2906_s4 + $0x4] ss:$24 sps:$4 sm:$0xff]   ;;  %v1981_v32 = vld [vmem:[%s2904_s2 + $0x70] ss:$24 sps:$4 sm:$0xff]   ;;  %v1990_v33 = vld [vmem:[%s2906_s4] ss:$24 sps:$4 sm:$0xff]  }
  0x41   :  { %259 = vmatpush1.bf16.msra.mxu0 %v1961_v9  ;;  %301 = vmatprep.subr.bf16.mxu1 %v1978_v20  ;;  %v1989_v31 = vld [vmem:[%s2904_s2 + $0xa4] ss:$24 sps:$4 sm:$0x3f]   ;;  %v1987_v34 = vld [vmem:[%s2904_s2 + $0xa0] ss:$24 sps:$4 sm:$0x3f]  }
  0x42   :  { %260 = vmatprep.subr.bf16.mxu0 %v240_v14  ;;  %v1998_v35 = vld [vmem:[%s2906_s4 + $0x34] ss:$24 sps:$4 sm:$0xff]   ;;  %v252_v36 = vand.u32 %v1989_v31, %v235_v10  ;;  %v1996_v37 = vld [vmem:[%s2906_s4 + $0x30] ss:$24 sps:$4 sm:$0xff]   ;;  %v249_v38 = vand.u32 %v1987_v34, %v235_v10  ;;  %v2004_v39 = vld [vmem:[%s2906_s4 + $0x64] ss:$24 sps:$4 sm:$0xff]  }
  0x43   :  { %v1995_v40 = vld [vmem:[%s2906_s4 + $0xc] ss:$24 sps:$4 sm:$0xff]   ;;  %v2002_v41 = vld [vmem:[%s2906_s4 + $0x60] ss:$24 sps:$4 sm:$0xff]   ;;  %v2008_v46 = vld [vmem:[%s2906_s4 + $0x90] ss:$24 sps:$4 sm:$0xff]  }
  0x44   :  { %302 = vmatpush1.bf16.msra.mxu1 %v1980_v22  ;;  %v1993_v42 = vld [vmem:[%s2906_s4 + $0x8] ss:$24 sps:$4 sm:$0xff]   ;;  %v2010_v43 = vld [vmem:[%s2906_s4 + $0x94] ss:$24 sps:$4 sm:$0xff]   ;;  %v1999_v45 = vld [vmem:[%s2906_s4 + $0x38] ss:$24 sps:$4 sm:$0xff]  }
  0x45   :  { %261 = vmatpush1.bf16.msra.mxu0 %v237_v17  ;;  %303 = vmatprep.subr.bf16.mxu1 %v246_v26  ;;  %v2007_v47 = vld [vmem:[%s2906_s4 + $0x6c] ss:$24 sps:$4 sm:$0xff]   ;;  %v2014_v49 = vld [vmem:[%s2906_s4 + $0xc0] ss:$24 sps:$4 sm:$0xff]   ;;  %v2013_v52 = vld [vmem:[%s2906_s4 + $0x9c] ss:$24 sps:$4 sm:$0xff]  }
  0x46   :  { %340 = vmatprep.subr.bf16.mxu0 %v1971_v19  ;;  %v2016_v48 = vld [vmem:[%s2906_s4 + $0xc4] ss:$24 sps:$4 sm:$0xff]   ;;  %v2005_v50 = vld [vmem:[%s2906_s4 + $0x68] ss:$24 sps:$4 sm:$0xff]   ;;  %v2022_v51 = vld [vmem:[%s2906_s4 + $0xf4] ss:$24 sps:$4 sm:$0xff]  }
  0x47   :  { %v2020_v53 = vld [vmem:[%s2906_s4 + $0xf0] ss:$24 sps:$4 sm:$0xff]   ;;  %v2028_v55 = vld [vmem:[%s2906_s4 + $0x124] ss:$24 sps:$4 sm:$0xff]   ;;  %v2026_v57 = vld [vmem:[%s2906_s4 + $0x120] ss:$24 sps:$4 sm:$0xff]  }
  0x48   :  { %1628 = vmatmul.mubr.msk.bf16.vlgmr.msra.gmra.mrb[0].mxu0 %vm228_vm2, %v1965_v18  ;;  %304 = vmatpush1.bf16.msra.mxu1 %v243_v28  ;;  %v2011_v54 = vld [vmem:[%s2906_s4 + $0x98] ss:$24 sps:$4 sm:$0xff]   ;;  %v2019_v56 = vld [vmem:[%s2906_s4 + $0xcc] ss:$24 sps:$4 sm:$0xff]   ;;  %v2017_v58 = vld [vmem:[%s2906_s4 + $0xc8] ss:$24 sps:$4 sm:$0xff]  }
  0x49   :  { %341 = vmatpush1.bf16.msra.mxu0 %v1969_v21  ;;  %372 = vmatprep.mubr.bf16.mxu0 %v2156_v0  ;;  %v2025_v59 = vld [vmem:[%s2906_s4 + $0xfc] ss:$24 sps:$4 sm:$0xff]   ;;  %v2023_v60 = vld [vmem:[%s2906_s4 + $0xf8] ss:$24 sps:$4 sm:$0xff]   ;;  %v2031_v61 = vld [vmem:[%s2906_s4 + $0x12c] ss:$24 sps:$4 sm:$0xff]  }
  0x4a   :  { %342 = vmatprep.subr.bf16.mxu0 %v1977_v25  ;;  %765 = vmatprep.subr.bf16.mxu1 %v1992_v30  ;;  %v2029_v62 = vld [vmem:[%s2906_s4 + $0x128] ss:$24 sps:$4 sm:$0xff]   ;;  %v2034_v63 = vld [vmem:[%s2906_s4 + $0x154] ss:$24 sps:$4 sm:$0xff]   ;;  %v2035_v3 = vld [vmem:[%s2906_s4 + $0x158] ss:$24 sps:$4 sm:$0xff]  }
  0x4b   :  { %1629 = vmatmul.mubr.msk.bf16.vlgmr.msra.gmra.mrb[0].mxu1 %vm228_vm2, %v1965_v18  ;;  %v2032_v1 = vld [vmem:[%s2906_s4 + $0x150] ss:$24 sps:$4 sm:$0xff]   ;;  %v2037_v2 = vld [vmem:[%s2906_s4 + $0x15c] ss:$24 sps:$4 sm:$0xff]   ;;  %v2038_v5 = vld [vmem:[%s2906_s4 + $0x180] ss:$24 sps:$4 sm:$0xff]  }
  0x4c   :  { %766 = vmatpush1.bf16.msra.mxu1 %v1990_v33  ;;  %v2040_v4 = vld [vmem:[%s2906_s4 + $0x184] ss:$24 sps:$4 sm:$0xff]   ;;  %v2041_v7 = vld [vmem:[%s2906_s4 + $0x188] ss:$24 sps:$4 sm:$0xff]   ;;  %v2046_v8 = vld [vmem:[%s2906_s4 + $0x14] ss:$24 sps:$4 sm:$0xff]  }
  0x4d   :  { %343 = vmatpush1.bf16.msra.mxu0 %v1975_v27  ;;  %767 = vmatprep.subr.bf16.mxu1 %v1998_v35  ;;  %v2043_v6 = vld [vmem:[%s2906_s4 + $0x18c] ss:$24 sps:$4 sm:$0xff]   ;;  %v2466_v13 = vshrl.u32 %v385_v12, 7  ;;  %v383_v15 = vld [vmem:[%s2905_s3] sm:$0x3]  ;;  %v920_v35 = vld [vmem:[%s2908_s6 + $0x90] sm:$0xff] }
  0x4e   :  { %344 = vmatprep.subr.bf16.mxu0 %v1983_v29  ;;  %v918_v9 = vld [vmem:[%s2908_s6 + $0x80] sm:$0xff]  ;;  %v919_v10 = vld [vmem:[%s2908_s6 + $0x88] sm:$0xff]  ;;  %vm1133_vm5 = vcmask 1043456   ;;  %vm2160_vm6 = vmmov 0   ;;  %vm1129_vm7 = vcmask 64512   ;;  %vm1359_vm8 = vcmask 1041408  }
  0x4f   :  { %v1825_v11 = vpack.c.bf16 %v919_v10, %v918_v9  ;;  %v387_v14 = vsub.s32 0, %v2466_v13  ;;  %v391_v16 = vsub.s32 1, %v2466_v13  ;;  %v902_v31 = vld [vmem:[%s2908_s6] sm:$0xff]  ;;  %vm1355_vm9 = vcmask 31744  }
  0x50   :  { %768 = vmatpush1.bf16.msra.mxu1 %v1996_v37  ;;  %v910_v10 = vld [vmem:[%s2908_s6 + $0x40] sm:$0xff]  ;;  %vm1410_vm10 = vcmask 261120   ;;  %vm1515_vm14 = vcmask 72704   ;;  %vm1595_vm0 = vcmask 122880  }
  0x51   :  { %345 = vmatpush1.bf16.msra.mxu0 %v1981_v32  ;;  %769 = vmatprep.subr.bf16.mxu1 %v2004_v39  ;;  %v388_v17 = vrot.slane %v383_v15, %v387_v14  ;;  %v903_v32 = vld [vmem:[%s2908_s6 + $0x8] sm:$0xff]  ;;  %vm1938_vm15 = vmpackc.low %vm1515_vm14, %vm1515_vm14 }
  0x52   :  { %346 = vmatprep.subr.bf16.mxu0 %v252_v36  ;;  %v921_v36 = vld [vmem:[%s2908_s6 + $0x98] sm:$0xff] }
  0x54   :  { %770 = vmatpush1.bf16.msra.mxu1 %v2002_v41 }
  0x55   :  { %347 = vmatpush1.bf16.msra.mxu0 %v249_v38  ;;  %771 = vmatprep.subr.bf16.mxu1 %v2010_v43  ;;  %v2044_v38 = vld [vmem:[%s2906_s4 + $0x10] ss:$24 sps:$4 sm:$0xff]  }
  0x56   :  { %808 = vmatprep.subr.bf16.mxu0 %v1995_v40  ;;  %v2049_v40 = vld [vmem:[%s2906_s4 + $0x44] ss:$24 sps:$4 sm:$0xff]  }
  0x58   :  { %1630 = vmatmul.mubr.msk.bf16.vlgmr.msra.gmra.mrb[4].mxu0 %vm228_vm2, %v1965_v18  ;;  %772 = vmatpush1.bf16.msra.mxu1 %v2008_v46  ;;  %v392_v18 = vrot.slane %v383_v15, %v391_v16  ;;  %v905_v46 = vld [vmem:[%s2908_s6 + $0x18] sm:$0xff]  ;;  %v928_v15 = vld [vmem:[%s2908_s6 + $0xd0] sm:$0xff] }
  0x59   :  { %809 = vmatpush1.bf16.msra.mxu0 %v1993_v42  ;;  %773 = vmatprep.subr.bf16.mxu1 %v2016_v48  ;;  %v1827_v42 = vpack.c.bf16 %v903_v32, %v902_v31  ;;  %v923_v48 = vld [vmem:[%s2908_s6 + $0xa8] sm:$0xff]  ;;  %v2067_v31 = vld [vmem:[%s2906_s4 + $0x164] ss:$24 sps:$4 sm:$0xff]   ;;  %v2065_v32 = vld [vmem:[%s2906_s4 + $0x160] ss:$24 sps:$4 sm:$0xff]  }
  0x5a   :  { %810 = vmatprep.subr.bf16.mxu0 %v2001_v44  ;;  %v1829_v44 = vpack.c.bf16 %v921_v36, %v920_v35  ;;  %v2070_v35 = vld [vmem:[%s2906_s4 + $0x194] ss:$24 sps:$4 sm:$0xff]   ;;  %v2068_v36 = vld [vmem:[%s2906_s4 + $0x190] ss:$24 sps:$4 sm:$0xff]  }
  0x5c   :  { %774 = vmatpush1.bf16.msra.mxu1 %v2014_v49  ;;  %v2047_v49 = vld [vmem:[%s2906_s4 + $0x40] ss:$24 sps:$4 sm:$0xff]  }
  0x5d   :  { %811 = vmatpush1.bf16.msra.mxu0 %v1999_v45  ;;  %775 = vmatprep.subr.bf16.mxu1 %v2022_v51  ;;  %v904_v45 = vld [vmem:[%s2908_s6 + $0x10] sm:$0xff] }
  0x5e   :  { %812 = vmatprep.subr.bf16.mxu0 %v2007_v47  ;;  %v922_v47 = vld [vmem:[%s2908_s6 + $0xa0] sm:$0xff]  ;;  %v1831_v51 = vpack.c.bf16 %v905_v46, %v904_v45  ;;  %v937_v45 = vld [vmem:[%s2908_s6 + $0x118] sm:$0xff] }
  0x60   :  { %776 = vmatpush1.bf16.msra.mxu1 %v2020_v53  ;;  %v906_v53 = vld [vmem:[%s2908_s6 + $0x20] sm:$0xff] }
  0x61   :  { %813 = vmatpush1.bf16.msra.mxu0 %v2005_v50  ;;  %777 = vmatprep.subr.bf16.mxu1 %v2028_v55  ;;  %v2052_v50 = vld [vmem:[%s2906_s4 + $0x74] ss:$24 sps:$4 sm:$0xff]  }
  0x62   :  { %814 = vmatprep.subr.bf16.mxu0 %v2013_v52  ;;  %v1833_v52 = vpack.c.bf16 %v923_v48, %v922_v47  ;;  %v924_v55 = vld [vmem:[%s2908_s6 + $0xb0] sm:$0xff]  ;;  %v938_v47 = vld [vmem:[%s2908_s6 + $0x120] sm:$0xff]  ;;  %v939_v48 = vld [vmem:[%s2908_s6 + $0x128] sm:$0xff] }
  0x64   :  { %778 = vmatpush1.bf16.msra.mxu1 %v2026_v57  ;;  %v2050_v57 = vld [vmem:[%s2906_s4 + $0x70] ss:$24 sps:$4 sm:$0xff]  }
  0x65   :  { %815 = vmatpush1.bf16.msra.mxu0 %v2011_v54  ;;  %779 = vmatprep.subr.bf16.mxu1 %v2034_v63  ;;  %v907_v54 = vld [vmem:[%s2908_s6 + $0x28] sm:$0xff] }
  0x66   :  { %816 = vmatprep.subr.bf16.mxu0 %v2019_v56  ;;  %v925_v56 = vld [vmem:[%s2908_s6 + $0xb8] sm:$0xff] }
  0x67   :  { %v1837_v63 = vpack.c.bf16 %v925_v56, %v924_v55  ;;  %v944_v55 = vld [vmem:[%s2908_s6 + $0x150] sm:$0xff]  ;;  %v945_v56 = vld [vmem:[%s2908_s6 + $0x158] sm:$0xff] }
  0x68   :  { %780 = vmatpush1.bf16.msra.mxu1 %v2032_v1  ;;  %v908_v1 = vld [vmem:[%s2908_s6 + $0x30] sm:$0xff] }
  0x69   :  { %817 = vmatpush1.bf16.msra.mxu0 %v2017_v58  ;;  %781 = vmatprep.subr.bf16.mxu1 %v2040_v4  ;;  %v926_v4 = vld [vmem:[%s2908_s6 + $0xc0] sm:$0xff] }
  0x6a   :  { %818 = vmatprep.subr.bf16.mxu0 %v2025_v59  ;;  %v2055_v59 = vld [vmem:[%s2906_s4 + $0xa4] ss:$24 sps:$4 sm:$0xff]  }
  0x6c   :  { %782 = vmatpush1.bf16.msra.mxu1 %v2038_v5  ;;  %v927_v5 = vld [vmem:[%s2908_s6 + $0xc8] sm:$0xff] }
  0x6d   :  { %819 = vmatpush1.bf16.msra.mxu0 %v2023_v60  ;;  %851 = vmatprep.subr.bf16.mxu1 %v2046_v8  ;;  %v1841_v9 = vpack.c.bf16 %v927_v5, %v926_v4  ;;  %v950_v5 = vld [vmem:[%s2908_s6 + $0x180] sm:$0xff] }
  0x6e   :  { %820 = vmatprep.subr.bf16.mxu0 %v2031_v61  ;;  %v1835_v61 = vpack.c.bf16 %v907_v54, %v906_v53  ;;  %v943_v53 = vld [vmem:[%s2908_s6 + $0x148] sm:$0xff] }
  0x71   :  { %821 = vmatpush1.bf16.msra.mxu0 %v2029_v62 }
  0x72   :  { %822 = vmatprep.subr.bf16.mxu0 %v2037_v2  ;;  %v909_v2 = vld [vmem:[%s2908_s6 + $0x38] sm:$0xff] }
  0x73   :  { %v1839_v8 = vpack.c.bf16 %v909_v2, %v908_v1  ;;  %v948_v1 = vld [vmem:[%s2908_s6 + $0x170] sm:$0xff]  ;;  %v949_v2 = vld [vmem:[%s2908_s6 + $0x178] sm:$0xff] }
  0x74   :  { %v1879_v4 = vpack.c.bf16 %v949_v2, %v948_v1 }
  0x75   :  { %823 = vmatpush1.bf16.msra.mxu0 %v2035_v3 }
  0x76   :  { %824 = vmatprep.subr.bf16.mxu0 %v2043_v6  ;;  %v2053_v6 = vld [vmem:[%s2906_s4 + $0xa0] ss:$24 sps:$4 sm:$0xff]  }
  0x79   :  { %825 = vmatpush1.bf16.msra.mxu0 %v2041_v7  ;;  %v2058_v7 = vld [vmem:[%s2906_s4 + $0xd4] ss:$24 sps:$4 sm:$0xff]  }
  0x7a   :  { %1826 = vmatprep.subr.bf16.mxu0 %v1825_v11  ;;  %v911_v11 = vld [vmem:[%s2908_s6 + $0x48] sm:$0xff] }
 0x11b   :  { %v288_v19 = vpop.f32.mrb[0].mxu0 }
 0x11c   :  { %v395_v20 = vadd.f32 %v388_v17, %v288_v19  ;;  %v290_v21 = vpop.f32.mrb[1].mxu0  ;;  %v2061_v19 = vld [vmem:[%s2906_s4 + $0x104] ss:$24 sps:$4 sm:$0xff]  }
 0x11d   :  { %v396_v22 = vadd.f32 %v392_v18, %v290_v21  ;;  %v292_v23 = vpop.f32.mrb[2].mxu0 }
 0x11e   :  { %v397_v24 = vadd.f32 %v388_v17, %v292_v23  ;;  %v294_v25 = vpop.f32.mrb[3].mxu0  ;;  %v399_v27 = vmax.f32 %v395_v20, 0.0  ;;  %v2485_v34 = vpop.f32.mrb[0].mxu1  ;;  %v929_v17 = vld [vmem:[%s2908_s6 + $0xd8] sm:$0xff]  ;;  %v1843_v20 = vpack.c.bf16 %v911_v11, %v910_v10  ;;  %v954_v11 = vld [vmem:[%s2908_s6 + $0x1a0] sm:$0xff] }
 0x11f   :  { %v398_v26 = vadd.f32 %v392_v18, %v294_v25  ;;  %v400_v29 = vmax.f32 %v396_v22, 0.0  ;;  %v2496_v39 = vpop.f32.mrb[1].mxu1  ;;  %v2056_v18 = vld [vmem:[%s2906_s4 + $0xd0] ss:$24 sps:$4 sm:$0xff]   ;;  %v1845_v21 = vpack.c.bf16 %v929_v17, %v928_v15  ;;  %v913_v23 = vld [vmem:[%s2908_s6 + $0x58] sm:$0xff] }
 0x120   :  { %v401_v28 = vmax.f32 %v397_v24, 0.0  ;;  %v2501_v41 = vpop.f32.mrb[2].mxu1  ;;  %v912_v22 = vld [vmem:[%s2908_s6 + $0x50] sm:$0xff]  ;;  %v930_v24 = vld [vmem:[%s2908_s6 + $0xe0] sm:$0xff]  ;;  %v931_v25 = vld [vmem:[%s2908_s6 + $0xe8] sm:$0xff] }
 0x121   :  { %v402_v30 = vmax.f32 %v398_v26, 0.0  ;;  %v2505_v43 = vpop.f32.mrb[3].mxu1  ;;  %v2059_v26 = vld [vmem:[%s2906_s4 + $0x100] ss:$24 sps:$4 sm:$0xff]   ;;  %v955_v15 = vld [vmem:[%s2908_s6 + $0x1a8] sm:$0xff] }
 0x122   :  { %v2483_v33 = vpack.c.bf16 %v401_v28, %v399_v27  ;;  %v2064_v27 = vld [vmem:[%s2906_s4 + $0x134] ss:$24 sps:$4 sm:$0xff]   ;;  %v1847_v28 = vpack.c.bf16 %v913_v23, %v912_v22  ;;  %v1888_v17 = vpack.c.bf16 %v955_v15, %v954_v11 }
 0x123   :  { %v404_v37 = vpack.c.bf16 %v402_v30, %v400_v29  ;;  %v1849_v29 = vpack.c.bf16 %v931_v25, %v930_v24  ;;  %v2062_v30 = vld [vmem:[%s2906_s4 + $0x130] ss:$24 sps:$4 sm:$0xff]   ;;  %v958_v24 = vld [vmem:[%s2908_s6 + $0x1c0] sm:$0xff] }
 0x124   :  { %v915_v22 = vld [vmem:[%s2908_s6 + $0x68] sm:$0xff] }
 0x125   :  { %1685 = vmatprep.mubr.msk.bf16.mxu1 %vm761_vm3, %v404_v37  ;;  %1686 = vmatprep.mubr.msk.bf16.mxu0 %vm761_vm3, %v404_v37  ;;  %v959_v25 = vld [vmem:[%s2908_s6 + $0x1c8] sm:$0xff] }
 0x126   :  { %798 = vmatmul.mubr.bf16.vlgmr.msra.gmra.mrb[4].mxu1 %v2483_v33  ;;  %841 = vmatmul.mubr.bf16.vlgmr.msra.gmra.mrb[8].mxu0 %v2483_v33 }
 0x127   :  { %852 = vmatpush1.bf16.msra.mxu1 %v2044_v38  ;;  %1687 = vmatprep.mubr.msk.bf16.mxu1 %vm761_vm3, %v404_v37  ;;  %v934_v37 = vld [vmem:[%s2908_s6 + $0x100] sm:$0xff]  ;;  %v935_v38 = vld [vmem:[%s2908_s6 + $0x108] sm:$0xff] }
 0x128   :  { %853 = vmatprep.subr.bf16.mxu1 %v2049_v40  ;;  %1828 = vmatpush3.bf16.msra.mxu0 %v1827_v42  ;;  %v1858_v40 = vpack.c.bf16 %v935_v38, %v934_v37  ;;  %v2158_v42 = vmov 0.0|0.0   ;;  %v471_v37 = vsub.s32 2, %v2466_v13  ;;  %v2742_v38 = vld [vmem:[%s2907_s5] sm:$0x3f] }
 0x129   :  { %1830 = vmatprep.subr.bf16.mxu0 %v1829_v44  ;;  %v936_v44 = vld [vmem:[%s2908_s6 + $0x110] sm:$0xff] }
 0x12a   :  { %v1861_v46 = vpack.c.bf16 %v937_v45, %v936_v44  ;;  %v464_v44 = vrot.slane %v2742_v38, %v387_v14  ;;  %v472_v45 = vrot.slane %v2742_v38, %v471_v37  ;;  %v1259_v37 = vld [vmem:[%s2909_s7 + $0x98] sm:$0xff] }
 0x12b   :  { %854 = vmatpush1.bf16.msra.mxu1 %v2047_v49  ;;  %v2543_v58 = vpop.f32.mrb[4].mxu0  ;;  %v1864_v49 = vpack.c.bf16 %v939_v48, %v938_v47 }
 0x12c   :  { %855 = vmatprep.subr.bf16.mxu1 %v2052_v50  ;;  %v2548_v60 = vpop.f32.mrb[5].mxu0  ;;  %1832 = vmatpush3.bf16.msra.mxu0 %v1831_v51  ;;  %v941_v50 = vld [vmem:[%s2908_s6 + $0x138] sm:$0xff] }
 0x12d   :  { %v2550_v62 = vpop.f32.mrb[6].mxu0  ;;  %1834 = vmatprep.subr.bf16.mxu0 %v1833_v52  ;;  %v942_v52 = vld [vmem:[%s2908_s6 + $0x140] sm:$0xff] }
 0x12e   :  { %v2558_v3 = vpop.f32.mrb[7].mxu0  ;;  %v1870_v54 = vpack.c.bf16 %v943_v53, %v942_v52 }
 0x12f   :  { %856 = vmatpush1.bf16.msra.mxu1 %v2050_v57  ;;  %v1873_v57 = vpack.c.bf16 %v945_v56, %v944_v55 }
 0x130   :  { %857 = vmatprep.subr.bf16.mxu1 %v2055_v59  ;;  %1836 = vmatpush3.bf16.msra.mxu0 %v1835_v61  ;;  %v946_v59 = vld [vmem:[%s2908_s6 + $0x160] sm:$0xff]  ;;  %v947_v61 = vld [vmem:[%s2908_s6 + $0x168] sm:$0xff] }
 0x131   :  { %1838 = vmatprep.subr.bf16.mxu0 %v1837_v63  ;;  %v1876_v63 = vpack.c.bf16 %v947_v61, %v946_v59 }
 0x133   :  { %858 = vmatpush1.bf16.msra.mxu1 %v2053_v6  ;;  %v951_v6 = vld [vmem:[%s2908_s6 + $0x188] sm:$0xff] }
 0x134   :  { %859 = vmatprep.subr.bf16.mxu1 %v2058_v7  ;;  %1840 = vmatpush3.bf16.msra.mxu0 %v1839_v8  ;;  %v1882_v7 = vpack.c.bf16 %v951_v6, %v950_v5  ;;  %v952_v8 = vld [vmem:[%s2908_s6 + $0x190] sm:$0xff] }
 0x135   :  { %1842 = vmatprep.subr.bf16.mxu0 %v1841_v9  ;;  %v953_v9 = vld [vmem:[%s2908_s6 + $0x198] sm:$0xff] }
 0x136   :  { %v1885_v10 = vpack.c.bf16 %v953_v9, %v952_v8 }
 0x137   :  { %860 = vmatpush1.bf16.msra.mxu1 %v2056_v18  ;;  %v956_v18 = vld [vmem:[%s2908_s6 + $0x1b0] sm:$0xff] }
 0x138   :  { %861 = vmatprep.subr.bf16.mxu1 %v2061_v19  ;;  %1844 = vmatpush3.bf16.msra.mxu0 %v1843_v20  ;;  %v957_v19 = vld [vmem:[%s2908_s6 + $0x1b8] sm:$0xff] }
 0x139   :  { %1846 = vmatprep.subr.bf16.mxu0 %v1845_v21  ;;  %v1891_v20 = vpack.c.bf16 %v957_v19, %v956_v18  ;;  %v914_v21 = vld [vmem:[%s2908_s6 + $0x60] sm:$0xff] }
 0x13a   :  { %v1851_v23 = vpack.c.bf16 %v915_v22, %v914_v21 }
 0x13b   :  { %862 = vmatpush1.bf16.msra.mxu1 %v2059_v26  ;;  %v1894_v26 = vpack.c.bf16 %v959_v25, %v958_v24  ;;  %v2073_v24 = vld [vmem:[#allocation4 + $0x8] ss:$0 sps:$4 sm:$0xff]   ;;  %v1256_v25 = vld [vmem:[%s2909_s7 + $0x80] sm:$0xff] }
 0x13c   :  { %863 = vmatprep.subr.bf16.mxu1 %v2064_v27  ;;  %1848 = vmatpush3.bf16.msra.mxu0 %v1847_v28  ;;  %v932_v27 = vld [vmem:[%s2908_s6 + $0xf0] sm:$0xff]  ;;  %v933_v28 = vld [vmem:[%s2908_s6 + $0xf8] sm:$0xff] }
 0x13d   :  { %1850 = vmatprep.subr.bf16.mxu0 %v1849_v29  ;;  %v1853_v29 = vpack.c.bf16 %v933_v28, %v932_v27 }
 0x13f   :  { %864 = vmatpush1.bf16.msra.mxu1 %v2062_v30  ;;  %v916_v30 = vld [vmem:[%s2908_s6 + $0x70] sm:$0xff] }
 0x140   :  { %865 = vmatprep.subr.bf16.mxu1 %v2067_v31  ;;  %1852 = vmatpush3.bf16.msra.mxu0 %v1851_v23  ;;  %v917_v31 = vld [vmem:[%s2908_s6 + $0x78] sm:$0xff] }
 0x141   :  { %1854 = vmatprep.subr.bf16.mxu0 %v1853_v29  ;;  %v1141_v29 = vsel %vm1133_vm5, %v2073_v24, 0  ;;  %v479_v24 = vsub.s32 4, %v2466_v13 }
 0x143   :  { %866 = vmatpush1.bf16.msra.mxu1 %v2065_v32  ;;  %v1855_v32 = vpack.c.bf16 %v917_v31, %v916_v30  ;;  %v1240_v31 = vld [vmem:[%s2909_s7] sm:$0xff] }
 0x144   :  { %867 = vmatprep.subr.bf16.mxu1 %v2070_v35  ;;  %v2159_v35 = vmov 0.0  }
 0x145   :  { %1856 = vmatpush3.bf16.msra.mxu0 %v1855_v32  ;;  %v1241_v32 = vld [vmem:[%s2909_s7 + $0x8] sm:$0xff] }
 0x147   :  { %868 = vmatpush1.bf16.msra.mxu1 %v2068_v36  ;;  %v960_v36 = vld [vmem:[%s2908_s6 + $0x1d0] sm:$0xff] }
 0x148   :  { %1857 = vmatprep.subr.bf16.mxu1 %v2158_v42 }
 0x14a   :  { %884 = vmatmul.mubr.bf16.vlgmr.msra.gmra.mrb[8].mxu1 %v2483_v33  ;;  %v940_v33 = vld [vmem:[%s2908_s6 + $0x130] sm:$0xff] }
 0x14b   :  { %1859 = vmatpush1.bf16.msra.mxu1 %v1858_v40  ;;  %v1867_v51 = vpack.c.bf16 %v941_v50, %v940_v33  ;;  %v475_v40 = vsub.s32 3, %v2466_v13 }
 0x14c   :  { %1860 = vmatprep.subr.bf16.mxu1 %v2158_v42 }
 0x14d   :  { %v476_v47 = vrot.slane %v2742_v38, %v475_v40  ;;  %v1898_v40 = vpack.c.bf16 %v1241_v32, %v1240_v31 }
 0x14f   :  { %1862 = vmatpush1.bf16.msra.mxu1 %v1861_v46  ;;  %v468_v46 = vrot.slane %v2742_v38, %v391_v16 }
 0x150   :  { %1863 = vmatprep.subr.bf16.mxu1 %v2158_v42 }
 0x153   :  { %1865 = vmatpush1.bf16.msra.mxu1 %v1864_v49 }
 0x154   :  { %1866 = vmatprep.subr.bf16.mxu1 %v2158_v42 }
 0x157   :  { %1868 = vmatpush1.bf16.msra.mxu1 %v1867_v51 }
 0x158   :  { %1869 = vmatprep.subr.bf16.mxu1 %v2158_v42 }
 0x15b   :  { %1871 = vmatpush1.bf16.msra.mxu1 %v1870_v54 }
 0x15c   :  { %1872 = vmatprep.subr.bf16.mxu1 %v2158_v42 }
 0x15f   :  { %1874 = vmatpush1.bf16.msra.mxu1 %v1873_v57 }
 0x160   :  { %1875 = vmatprep.subr.bf16.mxu1 %v2158_v42 }
 0x163   :  { %1877 = vmatpush1.bf16.msra.mxu1 %v1876_v63 }
 0x164   :  { %1878 = vmatprep.subr.bf16.mxu1 %v2158_v42 }
 0x167   :  { %1880 = vmatpush1.bf16.msra.mxu1 %v1879_v4 }
 0x168   :  { %1881 = vmatprep.subr.bf16.mxu1 %v2158_v42 }
 0x16b   :  { %1883 = vmatpush1.bf16.msra.mxu1 %v1882_v7 }
 0x16c   :  { %1884 = vmatprep.subr.bf16.mxu1 %v2158_v42 }
 0x16f   :  { %1886 = vmatpush1.bf16.msra.mxu1 %v1885_v10 }
 0x170   :  { %1887 = vmatprep.subr.bf16.mxu1 %v2158_v42 }
 0x173   :  { %1889 = vmatpush1.bf16.msra.mxu1 %v1888_v17 }
 0x174   :  { %1890 = vmatprep.subr.bf16.mxu1 %v2158_v42 }
 0x177   :  { %1892 = vmatpush1.bf16.msra.mxu1 %v1891_v20 }
 0x178   :  { %1893 = vmatprep.subr.bf16.mxu1 %v2158_v42 }
 0x17b   :  { %1895 = vmatpush1.bf16.msra.mxu1 %v1894_v26  ;;  %v1257_v26 = vld [vmem:[%s2909_s7 + $0x88] sm:$0xff] }
 0x17c   :  { %1095 = vmatprep.subr.mxu1 %v2159_v35  ;;  %v1896_v30 = vpack.c.bf16 %v1257_v26, %v1256_v25  ;;  %v483_v25 = vsub.s32 5, %v2466_v13  ;;  %v480_v26 = vrot.slane %v2742_v38, %v479_v24 }
 0x17f   :  { %1096 = vmatpush1.msra.mxu1 %v960_v36  ;;  %v1258_v36 = vld [vmem:[%s2909_s7 + $0x90] sm:$0xff] }
 0x180   :  { %1801 = vmatprep.subr.bf16.mxu1 %v2159_v35 }
 0x1f9   :  { %v799_v48 = vpop.f32.mrb[4].mxu1  ;;  %v842_v49 = vpop.f32.mrb[8].mxu0 }
 0x1fa   :  { %v800_v33 = vadd.f32 %v799_v48, %v464_v44  ;;  %v843_v50 = vadd.f32 %v842_v49, %v472_v45  ;;  %v801_v51 = vpop.f32.mrb[5].mxu1  ;;  %v844_v52 = vpop.f32.mrb[9].mxu0  ;;  %v1261_v48 = vld [vmem:[%s2909_s7 + $0xa8] sm:$0xff] }
 0x1fb   :  { %v802_v53 = vadd.f32 %v801_v51, %v468_v46  ;;  %v845_v54 = vadd.f32 %v844_v52, %v476_v47  ;;  %v803_v55 = vpop.f32.mrb[6].mxu1  ;;  %v846_v56 = vpop.f32.mrb[10].mxu0  ;;  %v1245_v51 = vld [vmem:[%s2909_s7 + $0x28] sm:$0xff]  ;;  %v1262_v52 = vld [vmem:[%s2909_s7 + $0xb0] sm:$0xff] }
 0x1fc   :  { %v894_v14 = vmul.f32 %v800_v33, %v2485_v34  ;;  %v896_v57 = vmul.f32 %v843_v50, %v2543_v58  ;;  %v804_v59 = vadd.f32 %v803_v55, %v464_v44  ;;  %v847_v61 = vadd.f32 %v846_v56, %v472_v45  ;;  %v805_v16 = vpop.f32.mrb[7].mxu1  ;;  %v848_v63 = vpop.f32.mrb[11].mxu0  ;;  %v1242_v45 = vld [vmem:[%s2909_s7 + $0x10] sm:$0xff]  ;;  %v1244_v50 = vld [vmem:[%s2909_s7 + $0x20] sm:$0xff] }
 0x1fd   :  { %v895_v1 = vmul.f32 %v802_v53, %v2496_v39  ;;  %v897_v2 = vmul.f32 %v845_v54, %v2548_v60  ;;  %v806_v4 = vadd.f32 %v805_v16, %v468_v46  ;;  %v849_v5 = vadd.f32 %v848_v63, %v476_v47  ;;  %v1119_v60 = vld [vmem:[#allocation4] sm:$0xff]  ;;  %v1243_v46 = vld [vmem:[%s2909_s7 + $0x18] sm:$0xff]  ;;  %v1260_v47 = vld [vmem:[%s2909_s7 + $0xa0] sm:$0xff] }
 0x1fe   :  { %v898_v6 = vmul.f32 %v804_v59, %v2501_v41  ;;  %v900_v7 = vmul.f32 %v847_v61, %v2550_v62  ;;  %v1691_v62 = vcombine.high %v1119_v60, %v1119_v60  ;;  %v1900_v44 = vpack.c.bf16 %v1259_v37, %v1258_v36  ;;  %v1263_v53 = vld [vmem:[%s2909_s7 + $0xb8] sm:$0xff]  ;;  %v1246_v56 = vld [vmem:[%s2909_s7 + $0x30] sm:$0xff]  ;;  %v1265_v59 = vld [vmem:[%s2909_s7 + $0xc8] sm:$0xff] }
 0x1ff   :  { %v899_v8 = vmul.f32 %v806_v4, %v2505_v43  ;;  %v901_v34 = vmul.f32 %v849_v5, %v2558_v3  ;;  %1032 = vmatprep.mubr.f32.mxu0 %v895_v1  ;;  %1688 = vmatprep.mubr.msk.f32.mxu1 %vm961_vm4, %v897_v2  ;;  %v1690_v3 = vcombine.low %v1119_v60, %v1119_v60  ;;  %v1248_v63 = vld [vmem:[%s2909_s7 + $0x40] sm:$0xff]  ;;  %v1249_v1 = vld [vmem:[%s2909_s7 + $0x48] sm:$0xff]  ;;  %v1266_v2 = vld [vmem:[%s2909_s7 + $0xd0] sm:$0xff] }
 0x200   :  { %1033 = vmatmul.mubr.f32.vlgmr.msra.gmra.mrb[12].mxu0 %v894_v14  ;;  %1108 = vmatmul.mubr.f32.vlgmr.msra.gmra.mrb[12].mxu1 %v896_v57  ;;  %v1902_v49 = vpack.c.bf16 %v1243_v46, %v1242_v45  ;;  %v1904_v33 = vpack.c.bf16 %v1261_v48, %v1260_v47  ;;  %v1906_v54 = vpack.c.bf16 %v1245_v51, %v1244_v50  ;;  %v1247_v14 = vld [vmem:[%s2909_s7 + $0x38] sm:$0xff]  ;;  %v1264_v57 = vld [vmem:[%s2909_s7 + $0xc0] sm:$0xff]  ;;  %v1269_v60 = vld [vmem:[%s2909_s7 + $0xe8] sm:$0xff] }
 0x201   :  { %1037 = vmatprep.mubr.f32.mxu0 %v899_v8  ;;  %1689 = vmatprep.mubr.msk.f32.mxu1 %vm961_vm4, %v901_v34  ;;  %v1135_v9 = vsel %vm1133_vm5, %v1690_v3, 0  ;;  %v1908_v55 = vpack.c.bf16 %v1263_v53, %v1262_v52  ;;  %v1910_v61 = vpack.c.bf16 %v1247_v14, %v1246_v56  ;;  %v1912_v16 = vpack.c.bf16 %v1265_v59, %v1264_v57  ;;  %v1267_v4 = vld [vmem:[%s2909_s7 + $0xd8] sm:$0xff]  ;;  %v1268_v34 = vld [vmem:[%s2909_s7 + $0xe0] sm:$0xff] }
 0x202   :  { %1693 = vmatprep.subr.msk.bf16.mxu0 %vm1133_vm5, %v1691_v62  ;;  %v1914_v5 = vpack.c.bf16 %v1249_v1, %v1248_v63  ;;  %v1251_v8 = vld [vmem:[%s2909_s7 + $0x58] sm:$0xff]  ;;  %v1920_v3 = vpack.c.bf16 %v1269_v60, %v1268_v34 }
 0x203   :  { %1144 = vmatpush1.bf16.msra.mxu0 %v1135_v9  ;;  %v1252_v9 = vld [vmem:[%s2909_s7 + $0x60] sm:$0xff]  ;;  %v1406_v46 = vld [vmem:[#allocation6] sm:$0xff] }
 0x204   :  { %1038 = vmatmul.mubr.f32.gmra.mrb[14].mxu0 %v898_v6  ;;  %1113 = vmatmul.mubr.f32.gmra.mrb[14].mxu1 %v900_v7  ;;  %v1916_v6 = vpack.c.bf16 %v1267_v4, %v1266_v2  ;;  %v1250_v7 = vld [vmem:[%s2909_s7 + $0x50] sm:$0xff]  ;;  %v1407_v47 = vld [vmem:[#allocation6 + $0x8] sm:$0xff] }
 0x205   :  { %1175 = vmatprep.mubr.bf16.mxu0 %v2156_v0  ;;  %1795 = vmatprep.subr.bf16.mxu0 %v2159_v35  ;;  %v1918_v62 = vpack.c.bf16 %v1251_v8, %v1250_v7  ;;  %v1696_v8 = vld [vmem:[%s2911_s9] ss:$0 sm:$0xff] }
 0x206   :  { %1803 = vmatprep.mubr.msk.bf16.mxu1 %vm2160_vm6, %v2159_v35 }
 0x21d   :  { %v2764_v39 = vpop.f32.mrb[8].mxu1 }
 0x21e   :  { %v2766_v41 = vpop.f32.mrb[9].mxu1 }
 0x21f   :  { %v2768_v58 = vpop.f32.mrb[10].mxu1 }
 0x220   :  { %v2770_v43 = vpop.f32.mrb[11].mxu1 }
 0x2d3   :  { %v1738_v0 = vpop.f32.mrb[12].mxu0  ;;  %v1109_v10 = vpop.f32.mrb[12].mxu1 }
 0x2d4   :  { %v1739_v11 = vpop.f32.mrb[13].mxu0  ;;  %v1111_v15 = vpop.f32.mrb[13].mxu1 }
 0x2d5   :  { %v1740_v17 = vadd.f32 %v1739_v11, %v1738_v0  ;;  %v1253_v0 = vld [vmem:[%s2909_s7 + $0x68] sm:$0xff]  ;;  %v1270_v11 = vld [vmem:[%s2909_s7 + $0xf0] sm:$0xff]  ;;  %v1271_v15 = vld [vmem:[%s2909_s7 + $0xf8] sm:$0xff] }
 0x2d7   :  { %v1110_v18 = vadd.f32 %v1740_v17, %v1109_v10  ;;  %v1741_v19 = vpop.f32.mrb[14].mxu0  ;;  %v1114_v20 = vpop.f32.mrb[14].mxu1  ;;  %v1922_v10 = vpack.c.bf16 %v1253_v0, %v1252_v9  ;;  %v1924_v17 = vpack.c.bf16 %v1271_v15, %v1270_v11 }
 0x2d8   :  { %v1742_v21 = vpop.f32.mrb[15].mxu0  ;;  %v1116_v22 = vpop.f32.mrb[15].mxu1 }
 0x2d9   :  { %v1743_v23 = vadd.f32 %v1742_v21, %v1741_v19  ;;  %v1255_v19 = vld [vmem:[%s2909_s7 + $0x78] sm:$0xff]  ;;  %v1349_v21 = vld [vmem:[%s2912_s10] sm:$0x3] }
 0x2da   :  { %v1361_v22 = vsel %vm1359_vm8, %v1349_v21, 0 }
 0x2db   :  { %v1115_v27 = vadd.f32 %v1743_v23, %v1114_v20  ;;  %1802 = vmatpush3.bf16.msra.mxu1 %v1361_v22  ;;  %v2074_v23 = vld [vmem:[%s2903_s1] sm:$0xff]  }
 0x2dc   :  { %1936 = vmatprep.subr.bf16.mxu1 %v2158_v42  ;;  %v890_v42 = vadd.f32 %v2768_v58, %v480_v26  ;;  %v1928_v58 = vpack.c.bf16 %v1407_v47, %v1406_v46 }
 0x2dd   :  { %v1118_v28 = vpack.c.bf16 %v1115_v27, %v1110_v18  ;;  %v1254_v18 = vld [vmem:[%s2909_s7 + $0x70] sm:$0xff]  ;;  %v484_v27 = vrot.slane %v2742_v38, %v483_v25  ;;  %v2161_v25 = vmov 1.0  }
 0x2de   :  { %v1926_v20 = vpack.c.bf16 %v1255_v19, %v1254_v18  ;;  %1804 = vmatmul.mubr.msk.bf16.vlgmr.msra.gmra.mrb[16].mxu1 %vm1355_vm9, %v2074_v23 }
 0x2df   :  { %1694 = vmatmul.mubr.msk.bf16.vlgmr.msra.gmra.mrb[16].mxu0 %vm1129_vm7, %v1118_v28  ;;  %1822 = vmatprep.mubr.msk.f32.mxu1 %vm2160_vm6, %v2159_v35  ;;  %v892_v36 = vadd.f32 %v2770_v43, %v484_v27  ;;  %v1408_v43 = vld [vmem:[#allocation6 + $0x10] sm:$0xff] }
 0x2e0   :  { %1796 = vmatpush3.bf16.msra.mxu0 %v1141_v29  ;;  %1797 = vmatprep.mubr.msk.bf16.mxu0 %vm2160_vm6, %v2159_v35  ;;  %v888_v29 = vadd.f32 %v2766_v41, %v484_v27 }
 0x2e1   :  { %1897 = vmatprep.subr.bf16.mxu0 %v1896_v30 }
 0x2e7   :  { %1798 = vmatmul.mubr.msk.bf16.vlgmr.msra.gmra.mrb[20].mxu0 %vm1129_vm7, %v1118_v28  ;;  %v886_v28 = vadd.f32 %v2764_v39, %v480_v26 }
 0x2e8   :  { %1899 = vmatpush3.bf16.msra.mxu0 %v1898_v40 }
 0x2e9   :  { %1901 = vmatprep.subr.bf16.mxu0 %v1900_v44 }
 0x2ec   :  { %1903 = vmatpush3.bf16.msra.mxu0 %v1902_v49 }
 0x2ed   :  { %1905 = vmatprep.subr.bf16.mxu0 %v1904_v33  ;;  %v1409_v33 = vld [vmem:[#allocation6 + $0x18] sm:$0xff] }
 0x2ee   :  { %v1932_v51 = vpack.c.bf16 %v1409_v33, %v1408_v43 }
 0x2f0   :  { %1907 = vmatpush3.bf16.msra.mxu0 %v1906_v54 }
 0x2f1   :  { %1909 = vmatprep.subr.bf16.mxu0 %v1908_v55 }
 0x2f4   :  { %1911 = vmatpush3.bf16.msra.mxu0 %v1910_v61 }
 0x2f5   :  { %1913 = vmatprep.subr.bf16.mxu0 %v1912_v16 }
 0x2f8   :  { %1915 = vmatpush3.bf16.msra.mxu0 %v1914_v5 }
 0x2f9   :  { %1917 = vmatprep.subr.bf16.mxu0 %v1916_v6 }
 0x2fc   :  { %1919 = vmatpush3.bf16.msra.mxu0 %v1918_v62  ;;  %v1505_v62 = vand.u32 127, %v385_v12 }
 0x2fd   :  { %1921 = vmatprep.subr.bf16.mxu0 %v1920_v3 }
 0x2fe   :  { %vm1506_vm11 = vcmp.lt.s32.totalorder %v1505_v62, 8 }
 0x300   :  { %1923 = vmatpush3.bf16.msra.mxu0 %v1922_v10 }
 0x301   :  { %1925 = vmatprep.subr.bf16.mxu0 %v1924_v17 }
 0x304   :  { %1927 = vmatpush3.bf16.msra.mxu0 %v1926_v20 }
 0x305   :  { %1929 = vmatprep.subr.bf16.mxu0 %v1928_v58 }
 0x3b1   :  { %v1397_v48 = vpop.f32.mrb[16].mxu1 }
 0x3b2   :  { %v1177_v30 = vpop.f32.mrb[16].mxu0  ;;  %v1805_v49 = vpop.f32.mrb[17].mxu1 }
 0x3b3   :  { %v1236_v31 = vmul.f32 %v1177_v30, %v886_v28  ;;  %v1179_v32 = vpop.f32.mrb[17].mxu0  ;;  %v1400_v50 = vpop.f32.mrb[18].mxu1 }
 0x3b4   :  { %v1237_v35 = vmul.f32 %v1179_v32, %v888_v29  ;;  %v1181_v37 = vpop.f32.mrb[18].mxu0  ;;  %v1806_v52 = vpop.f32.mrb[19].mxu1 }
 0x3b5   :  { %v1238_v40 = vmul.f32 %v1181_v37, %v890_v42  ;;  %v1183_v44 = vpop.f32.mrb[19].mxu0 }
 0x3b6   :  { %v1239_v13 = vmul.f32 %v1183_v44, %v892_v36  ;;  %1336 = vmatprep.mubr.f32.mxu0 %v1237_v35 }
 0x3b7   :  { %1337 = vmatmul.mubr.f32.vlgmr.msra.gmra.mrb[24].mxu0 %v1236_v31 }
 0x3b8   :  { %1341 = vmatprep.mubr.f32.mxu0 %v1239_v13  ;;  %1931 = vmatpush3.bf16.msra.mxu0 %v1928_v58 }
 0x3b9   :  { %1933 = vmatprep.subr.bf16.mxu0 %v1932_v51 }
 0x3ba   :  { %v1220_v38 = vpop.f32.mrb[20].mxu0 }
 0x3bb   :  { %v1799_v45 = vpop.f32.mrb[21].mxu0  ;;  %1342 = vmatmul.mubr.f32.gmra.mrb[26].mxu0 %v1238_v40  ;;  %v1234_v60 = vadd.f32 %v1696_v8, %v1220_v38 }
 0x3bc   :  { %v1223_v39 = vpop.f32.mrb[22].mxu0  ;;  %1935 = vmatpush3.bf16.msra.mxu0 %v1932_v51 }
 0x3bd   :  { %v1800_v41 = vpop.f32.mrb[23].mxu0  ;;  %v1235_v34 = vadd.f32 %v1696_v8, %v1223_v39  ;;  %v1509_v10 = vand.u32 2147483647, %v1234_v60 }
 0x3bf   :  { %v1510_v9 = vand.u32 2147483647, %v1235_v34  ;;  %v1511_v23 = vsel %vm1506_vm11, %v1509_v10, %v1234_v60 }
 0x3c1   :  { %v1512_v18 = vsel %vm1506_vm11, %v1510_v9, %v1235_v34 }
 0x48a   :  { %v1778_v53 = vpop.f32.mrb[24].mxu0 }
 0x48b   :  { %v1779_v54 = vpop.f32.mrb[25].mxu0 }
 0x48c   :  { %v1780_v55 = vadd.f32 %v1779_v54, %v1778_v53 }
 0x48e   :  { %v1347_v56 = vand.u32 2147483647, %v1780_v55  ;;  %v1781_v14 = vpop.f32.mrb[26].mxu0 }
 0x48f   :  { %v1782_v57 = vpop.f32.mrb[27].mxu0 }
 0x490   :  { %v1404_v59 = vmul.f32 %v1397_v48, %v1347_v56  ;;  %v1783_v61 = vadd.f32 %v1782_v57, %v1781_v14 }
 0x492   :  { %v1348_v16 = vand.u32 2147483647, %v1783_v61  ;;  %1815 = vmatprep.mubr.msk.f32.mxu0 %vm1410_vm10, %v1404_v59 }
 0x494   :  { %v1405_v63 = vmul.f32 %v1400_v50, %v1348_v16 }
 0x496   :  { %1816 = vmatmul.mubr.msk.f32.vlgmr.msra.gmra.mrb[28].mxu0 %vm1410_vm10, %v1405_v63 }
 0x569   :  { %v1817_v1 = vpop.f32.mrb[28].mxu0 }
 0x56a   :  { %v1495_v2 = vmin.f32 %v1817_v1, 0.0  ;;  %v1483_v4 = vpop.f32.mrb[29].mxu0  ;;  %vm1493_vm12 = vcmp.gt.f32.partialorder %v1817_v1, 0.0 }
 0x56b   :  { %v1494_v5 = vmin.f32 %v1483_v4, 0.0  ;;  %vm1492_vm13 = vcmp.gt.f32.partialorder %v1483_v4, 0.0 }
 0x56c   :  { %v1498_v6 = vmul.f32 1.442695, %v1495_v2 }
 0x56d   :  { %v1496_v7 = vmul.f32 1.442695, %v1494_v5 }
 0x56e   :  { %2075 = vpow2.f32 %v1498_v6 }
 0x56f   :  { %2077 = vpow2.f32 %v1496_v7 }
 0x578   :  { %v2076_v3 = vpop.eup %2075 }
 0x579   :  { %v2078_v0 = vpop.eup %2077  ;;  %v1702_v11 = vadd.f32 -1.0, %v2076_v3 }
 0x57a   :  { %v1701_v15 = vadd.f32 -1.0, %v2078_v0 }
 0x57b   :  { %v1503_v17 = vsel %vm1493_vm12, %v1817_v1, %v1702_v11 }
 0x57c   :  { %v1508_v19 = vsel %vm1506_vm11, %v1503_v17, 1.0  ;;  %v1502_v20 = vsel %vm1492_vm13, %v1483_v4, %v1701_v15 }
 0x57d   :  { %v1514_v21 = vmul.f32 %v1512_v18, %v1508_v19  ;;  %v1507_v22 = vsel %vm1506_vm11, %v1502_v20, 1.0 }
 0x57e   :  { %v1513_v24 = vmul.f32 %v1511_v23, %v1507_v22 }
 0x580   :  { %v1937_v12 = vpack.c.bf16 %v1514_v21, %v1513_v24 }
 0x582   :  { %1939 = vmatpush3.bf16.xpose.msk.msra.mxu1 %vm1938_vm15, %v1937_v12 }
 0x589   :  { %1823 = vmatmul.mubr.msk.f32.vlgmr.msra.gmra.mrb[20].mxu1 %vm1515_vm14, %v2161_v25 }
 0x65c   :  { %v1591_v26 = vpop.f32.mrb[20].mxu1 }
 0x65d   :  { %1596 = vst.msk [vmem:[%s2914_s12] sm:$0x1] %vm1595_vm0, %v1591_v26  ;;  %v1824_v27 = vpop.f32.mrb[21].mxu1 }
 0x65e   :  { %1601 = vsyncpa [#allocation3], 1 }
 0x65f   :  { %1602 = vsyncpa [#allocation5], 1 }

</bundles_post_ra>
